<compile_context>
chip_gen: v6e
topology: v6e:2x2x1
jax: 0.10.0
libtpu: 0.0.40
codegen_flags: <defaults>
</compile_context>

<pallas_src>
import jax
import jax.numpy as jnp
from jax.experimental import pallas as pl
from jax.experimental.pallas import tpu as pltpu


HIDDEN = 512
OUT = 1


def _round_up(n, m):
    return ((n + m - 1) // m) * m


def net_kernel(x_ref, w1_ref, b1_ref, w2_ref, b2_ref, o_ref):
    # fc1 in transposed orientation so the batch lands on the lane axis:
    #   h[j, b] = sum_d w1[j, d] * x[b, d]            -> (HIDDEN, TB) on the MXU
    h = jnp.einsum(
        "hd,bd->hb",
        w1_ref[...],
        x_ref[...],
        preferred_element_type=jnp.float32,
    )
    h = h + b1_ref[...]                               # (HIDDEN, 1) lane-broadcast add
    # dropout: inference-mode identity
    h = jax.nn.sigmoid(h)                             # exp / reciprocal on the EUP
    # fc3 as VPU multiply + cross-sublane reduction (no N=1 MXU pass):
    #   y[b] = sum_j h[j, b] * w2[j]
    y = jnp.sum(h * w2_ref[...], axis=0, keepdims=True)   # (1, TB), lane-dense
    o_ref[...] = (y + b2_ref[0, 0]).astype(o_ref.dtype)


def net_forward(x, w1, b1, w2, b2, *, tb=1024):
    """x: (B, D). PyTorch-layout params: w1 (512, D), b1 (512,), w2 (1, 512), b2 (1,)."""
    B, D = x.shape
    assert w1.shape == (HIDDEN, D)

    # Batch tile: lane-dense multiple of 128 when tiling, otherwise one full block.
    if B <= tb:
        TB = _round_up(B, 8)
    else:
        TB = _round_up(tb, 128)
    B_pad = _round_up(B, TB)
    if B_pad != B:
        x = jnp.pad(x, ((0, B_pad - B), (0, 0)))

    # Kernel-side layouts: biases / fc3 weight as columns, b2 as an SMEM scalar.
    b1c = b1.reshape(HIDDEN, 1).astype(jnp.float32)
    w2c = w2.reshape(HIDDEN, 1).astype(jnp.float32)
    b2s = b2.reshape(1, 1).astype(jnp.float32)

    grid = (B_pad // TB,)

    out_t = pl.pallas_call(
        net_kernel,
        out_shape=jax.ShapeDtypeStruct((1, B_pad), x.dtype),
        grid_spec=pltpu.PrefetchScalarGridSpec(
            num_scalar_prefetch=0,
            grid=grid,
            in_specs=[
                pl.BlockSpec((TB, D), lambda i: (i, 0)),        # x: streams per tile
                pl.BlockSpec((HIDDEN, D), lambda i: (0, 0)),    # w1: VMEM-resident
                pl.BlockSpec((HIDDEN, 1), lambda i: (0, 0)),    # b1: VMEM-resident
                pl.BlockSpec((HIDDEN, 1), lambda i: (0, 0)),    # w2: VMEM-resident
                pl.BlockSpec(memory_space=pltpu.MemorySpace.SMEM),  # b2: scalar
            ],
            out_specs=pl.BlockSpec((1, TB), lambda i: (0, i)),  # lane-dense output row
        ),
        compiler_params=pltpu.CompilerParams(
            dimension_semantics=("parallel",),
            vmem_limit_bytes=32 * 1024 * 1024,
        ),
    )(x, w1, b1c, w2c, b2s)

    # Back to PyTorch (B, 1) layout, dropping batch padding.
    return out_t[0, :B].reshape(B, OUT)


if __name__ == "__main__":
    key = jax.random.PRNGKey(0)
    B, input_dim = 8, 32

    k_x, k_w1, k_b1, k_w2, k_b2 = jax.random.split(key, 5)

    x = jax.random.normal(k_x, (B, input_dim), dtype=jnp.float32)

    # PyTorch-style init bounds U(-1/sqrt(fan_in), 1/sqrt(fan_in)), PyTorch layouts.
    bound1 = 1.0 / jnp.sqrt(jnp.float32(input_dim))
    w1 = jax.random.uniform(k_w1, (HIDDEN, input_dim), jnp.float32, -bound1, bound1)
    b1 = jax.random.uniform(k_b1, (HIDDEN,), jnp.float32, -bound1, bound1)

    bound2 = 1.0 / jnp.sqrt(jnp.float32(HIDDEN))
    w2 = jax.random.uniform(k_w2, (OUT, HIDDEN), jnp.float32, -bound2, bound2)
    b2 = jax.random.uniform(k_b2, (OUT,), jnp.float32, -bound2, bound2)

    out = net_forward(x, w1, b1, w2, b2)
    out = jax.block_until_ready(out)

    # Pure-JAX reference (eval-mode dropout = identity).
    ref = jax.nn.sigmoid(x @ w1.T + b1[None, :]) @ w2.T + b2[None, :]
    assert out.shape == (B, OUT)
    max_err = float(jnp.max(jnp.abs(out - ref)))
    assert jnp.allclose(out, ref, atol=1e-4, rtol=1e-4), max_err

    print("KERNEL_OK")
</pallas_src>

<mosaic_0001>
module attributes {stable_mosaic.version = 11 : i64} {
  func.func @net_kernel(%arg0: i32, %arg1: memref<8x32xf32, #tpu.memory_space<vmem>>, %arg2: memref<512x32xf32, #tpu.memory_space<vmem>>, %arg3: memref<512x1xf32, #tpu.memory_space<vmem>>, %arg4: memref<512x1xf32, #tpu.memory_space<vmem>>, %arg5: memref<1x1xf32, #tpu.memory_space<smem>>, %arg6: memref<1x8xf32, #tpu.memory_space<vmem>>) attributes {dimension_semantics = [#tpu.dimension_semantics<parallel>], iteration_bounds = array<i64: 1>, scalar_prefetch = 0 : i64, scratch_operands = 0 : i64, tpu.core_type = #tpu.core_type<tc>, window_params = [{transform_indices = @transform_0, window_bounds = array<i64: 8, 32>}, {pipeline_mode = #tpu.pipeline_mode<synchronous>, transform_indices = @transform_1, window_bounds = array<i64: 512, 32>}, {pipeline_mode = #tpu.pipeline_mode<synchronous>, transform_indices = @transform_2, window_bounds = array<i64: 512, 1>}, {pipeline_mode = #tpu.pipeline_mode<synchronous>, transform_indices = @transform_3, window_bounds = array<i64: 512, 1>}, {transform_indices = @transform_4, window_bounds = array<i64: 1, 1>}, {transform_indices = @transform_5, window_bounds = array<i64: 1, 8>}]} {
    %c0 = arith.constant 0 : index
    %c0_0 = arith.constant 0 : index
    %0 = vector.load %arg2[%c0, %c0_0] : memref<512x32xf32, #tpu.memory_space<vmem>>, vector<512x32xf32>
    %c0_1 = arith.constant 0 : index
    %c0_2 = arith.constant 0 : index
    %1 = vector.load %arg1[%c0_1, %c0_2] : memref<8x32xf32, #tpu.memory_space<vmem>>, vector<8x32xf32>
    "tpu.trace_start"() <{level = 10 : i32, message = "hd,bd->hb"}> : () -> ()
    %cst = arith.constant dense<0.000000e+00> : vector<512x8xf32>
    %2 = tpu.matmul %0, %1, %cst {dimension_numbers = #tpu.dot_dimension_numbers<[1], [1], [0], [0], [0, 0, 1, 0], [], []>} : vector<512x32xf32>, vector<8x32xf32>, vector<512x8xf32> -> vector<512x8xf32>
    "tpu.trace_stop"() : () -> ()
    %c0_3 = arith.constant 0 : index
    %c0_4 = arith.constant 0 : index
    %3 = vector.load %arg3[%c0_3, %c0_4] : memref<512x1xf32, #tpu.memory_space<vmem>>, vector<512x1xf32>
    %4 = vector.broadcast %3 : vector<512x1xf32> to vector<512x8xf32>
    %5 = arith.addf %2, %4 : vector<512x8xf32>
    %6 = arith.negf %5 : vector<512x8xf32>
    %7 = math.exp %6 : vector<512x8xf32>
    %cst_5 = arith.constant 1.000000e+00 : f32
    %8 = vector.broadcast %cst_5 : f32 to vector<512x8xf32>
    %9 = arith.addf %8, %7 : vector<512x8xf32>
    %10 = arith.divf %8, %9 : vector<512x8xf32>
    %c0_6 = arith.constant 0 : index
    %c0_7 = arith.constant 0 : index
    %11 = vector.load %arg4[%c0_6, %c0_7] : memref<512x1xf32, #tpu.memory_space<vmem>>, vector<512x1xf32>
    %12 = vector.broadcast %11 : vector<512x1xf32> to vector<512x8xf32>
    %13 = arith.mulf %10, %12 : vector<512x8xf32>
    %cst_8 = arith.constant dense<0.000000e+00> : vector<8xf32>
    %14 = vector.multi_reduction <add>, %13, %cst_8 [0] : vector<512x8xf32> to vector<8xf32>
    %15 = vector.shape_cast %14 : vector<8xf32> to vector<1x8xf32>
    %c0_9 = arith.constant 0 : index
    %c0_10 = arith.constant 0 : index
    %16 = memref.load %arg5[%c0_9, %c0_10] : memref<1x1xf32, #tpu.memory_space<smem>>
    %17 = vector.broadcast %16 : f32 to vector<1x8xf32>
    %18 = arith.addf %15, %17 : vector<1x8xf32>
    %c0_11 = arith.constant 0 : index
    %c0_12 = arith.constant 0 : index
    %19 = vector.load %arg6[%c0_11, %c0_12] : memref<1x8xf32, #tpu.memory_space<vmem>>, vector<1x8xf32>
    tpu.vector_store %arg6[%c0_11, %c0_12], %18 {strides = array<i32>} : memref<1x8xf32, #tpu.memory_space<vmem>>, vector<1x8xf32>,
    return
  }
  func.func @transform_0(%arg0: i32) -> (i32, i32) {
    %c0_i32 = arith.constant 0 : i32
    %c0_i32_0 = arith.constant 0 : i32
    return %arg0, %c0_i32 : i32, i32
  }
  func.func @transform_1(%arg0: i32) -> (i32, i32) {
    %c0_i32 = arith.constant 0 : i32
    %c0_i32_0 = arith.constant 0 : i32
    %c0_i32_1 = arith.constant 0 : i32
    return %c0_i32, %c0_i32_0 : i32, i32
  }
  func.func @transform_2(%arg0: i32) -> (i32, i32) {
    %c0_i32 = arith.constant 0 : i32
    %c0_i32_0 = arith.constant 0 : i32
    %c0_i32_1 = arith.constant 0 : i32
    return %c0_i32, %c0_i32_0 : i32, i32
  }
  func.func @transform_3(%arg0: i32) -> (i32, i32) {
    %c0_i32 = arith.constant 0 : i32
    %c0_i32_0 = arith.constant 0 : i32
    %c0_i32_1 = arith.constant 0 : i32
    return %c0_i32, %c0_i32_0 : i32, i32
  }
  func.func @transform_4(%arg0: i32) -> (i32, i32) {
    %c0_i32 = arith.constant 0 : i32
    %c0_i32_0 = arith.constant 0 : i32
    %c0_i32_1 = arith.constant 0 : i32
    return %c0_i32, %c0_i32_0 : i32, i32
  }
  func.func @transform_5(%arg0: i32) -> (i32, i32) {
    %c0_i32 = arith.constant 0 : i32
    %c0_i32_0 = arith.constant 0 : i32
    return %c0_i32, %arg0 : i32, i32
  }
}

</mosaic_0001>

<bundles_post_ra>
// kernel: tpu_custom_call.1
= control target key start
LH: loop header
LB: loop body
LE: loop exit
PB: predicated region body
PF: predicated region fallthrough
CT: control target
= control target key end

     0   :  { %vm471_vm0 = vcmask 261120   ;;  %v2613_v3 = vmov 0   ;;  %s3809_s0 = inlined_call_operand.vmem [shape: f32[8,32], index: 0, kind: input, shape index: {}]   ;;  %s3810_s1 = inlined_call_operand.vmem [shape: f32[512,32], index: 1, kind: input, shape index: {}]   ;;  %s3811_s2 = inlined_call_operand.vmem [shape: f32[512,1], index: 2, kind: input, shape index: {}]   ;;  %s3812_s3 = inlined_call_operand.vmem [shape: f32[512,1], index: 3, kind: input, shape index: {}]   ;;  %s3813_s4 = inlined_call_operand.<no memory space> [shape: f32[1,1], index: 4, kind: input, shape index: {}]   ;;  %s3814_s5 = inlined_call_operand.hbm [shape: f32[1,8], index: 5, kind: output, shape index: {}]  }
   0x1   :  { %v86_v0 = vld [vmem:[%s3809_s0] sm:$0xff]  ;;  %v89_v1 = vld [vmem:[%s3811_s2 + $0x10] sm:$0xff]  ;;  %2334 = vset.pattern.permute.xlu1 %v2613_v3  ;;  %2333 = vset.pattern.permute.xlu0 %v2613_v3  ;;  %v23_v6 = vld [vmem:[%s3810_s1 + $0x8] sm:$0xff] }
   0x2   :  { %v87_v2 = vld [vmem:[%s3811_s2] sm:$0xff]  ;;  %2231 = vmatprep.subr.msk.mxu0 %vm471_vm0, %v86_v0  ;;  %2329 = vmatprep.subr.msk.mxu1 %vm471_vm0, %v86_v0  ;;  %v55_v7 = vld [vmem:[%s3810_s1 + $0x108] sm:$0xff]  ;;  %v90_v8 = vld [vmem:[%s3811_s2 + $0x18] sm:$0xff] }
   0x3   :  { %v22_v4 = vld [vmem:[%s3810_s1] sm:$0xff]  ;;  %163 = vperm.xlu1 %2334, %v89_v1   ;;  %153 = vperm.xlu0 %2333, %v87_v2   ;;  %v88_v9 = vld [vmem:[%s3811_s2 + $0x8] sm:$0xff]  ;;  %v24_v10 = vld [vmem:[%s3810_s1 + $0x10] sm:$0xff] }
   0x4   :  { %v54_v5 = vld [vmem:[%s3810_s1 + $0x100] sm:$0xff]  ;;  %2232 = vmatpush3.xpose.msk.msra.mxu0 %vm471_vm0, %v86_v0  ;;  %2330 = vmatpush3.xpose.msk.msra.mxu1 %vm471_vm0, %v86_v0  ;;  %v56_v11 = vld [vmem:[%s3810_s1 + $0x110] sm:$0xff]  ;;  %v25_v12 = vld [vmem:[%s3810_s1 + $0x18] sm:$0xff] }
   0x5   :  { %2233 = vmatprep.mubr.msk.f32.mxu0 %vm471_vm0, %v22_v4  ;;  %2281 = vmatprep.mubr.msk.f32.mxu1 %vm471_vm0, %v54_v5  ;;  %v57_v13 = vld [vmem:[%s3810_s1 + $0x118] sm:$0xff]  ;;  %v92_v14 = vld [vmem:[%s3811_s2 + $0x28] sm:$0xff]  ;;  %v91_v15 = vld [vmem:[%s3811_s2 + $0x20] sm:$0xff] }
   0x6   :  { %v26_v16 = vld [vmem:[%s3810_s1 + $0x20] sm:$0xff]  ;;  %v27_v18 = vld [vmem:[%s3810_s1 + $0x28] sm:$0xff]  ;;  %v94_v20 = vld [vmem:[%s3811_s2 + $0x38] sm:$0xff] }
   0x7   :  { %2234 = vmatmul.mubr.msk.f32.vlgmr.msra.gmra.mxu0 %vm471_vm0, %v23_v6  ;;  %2282 = vmatmul.mubr.msk.f32.vlgmr.msra.gmra.mxu1 %vm471_vm0, %v55_v7  ;;  %v58_v17 = vld [vmem:[%s3810_s1 + $0x120] sm:$0xff]  ;;  %v59_v19 = vld [vmem:[%s3810_s1 + $0x128] sm:$0xff]  ;;  %v93_v21 = vld [vmem:[%s3811_s2 + $0x30] sm:$0xff] }
   0x8   :  { %168 = vperm.xlu1 %2334, %v90_v8   ;;  %158 = vperm.xlu0 %2333, %v88_v9   ;;  %v28_v22 = vld [vmem:[%s3810_s1 + $0x30] sm:$0xff]  ;;  %v29_v24 = vld [vmem:[%s3810_s1 + $0x38] sm:$0xff]  ;;  %v96_v26 = vld [vmem:[%s3811_s2 + $0x48] sm:$0xff] }
   0x9   :  { %2236 = vmatprep.mubr.msk.f32.mxu0 %vm471_vm0, %v24_v10  ;;  %2284 = vmatprep.mubr.msk.f32.mxu1 %vm471_vm0, %v56_v11  ;;  %v60_v23 = vld [vmem:[%s3810_s1 + $0x130] sm:$0xff]  ;;  %v61_v25 = vld [vmem:[%s3810_s1 + $0x138] sm:$0xff]  ;;  %v95_v27 = vld [vmem:[%s3811_s2 + $0x40] sm:$0xff] }
   0xa   :  { %v30_v28 = vld [vmem:[%s3810_s1 + $0x40] sm:$0xff]  ;;  %v31_v30 = vld [vmem:[%s3810_s1 + $0x48] sm:$0xff]  ;;  %v98_v32 = vld [vmem:[%s3811_s2 + $0x58] sm:$0xff] }
   0xb   :  { %2237 = vmatmul.mubr.msk.f32.gmra.mxu0 %vm471_vm0, %v25_v12  ;;  %2285 = vmatmul.mubr.msk.f32.gmra.mxu1 %vm471_vm0, %v57_v13  ;;  %v62_v29 = vld [vmem:[%s3810_s1 + $0x140] sm:$0xff]  ;;  %v63_v31 = vld [vmem:[%s3810_s1 + $0x148] sm:$0xff]  ;;  %v97_v33 = vld [vmem:[%s3811_s2 + $0x50] sm:$0xff] }
   0xc   :  { %178 = vperm.xlu1 %2334, %v92_v14   ;;  %173 = vperm.xlu0 %2333, %v91_v15   ;;  %v32_v34 = vld [vmem:[%s3810_s1 + $0x50] sm:$0xff]  ;;  %v33_v36 = vld [vmem:[%s3810_s1 + $0x58] sm:$0xff]  ;;  %v100_v38 = vld [vmem:[%s3811_s2 + $0x68] sm:$0xff] }
   0xd   :  { %2239 = vmatprep.mubr.msk.f32.mxu0 %vm471_vm0, %v26_v16  ;;  %2287 = vmatprep.mubr.msk.f32.mxu1 %vm471_vm0, %v58_v17  ;;  %v64_v35 = vld [vmem:[%s3810_s1 + $0x150] sm:$0xff]  ;;  %v65_v37 = vld [vmem:[%s3810_s1 + $0x158] sm:$0xff]  ;;  %v99_v39 = vld [vmem:[%s3811_s2 + $0x60] sm:$0xff] }
   0xe   :  { %v34_v40 = vld [vmem:[%s3810_s1 + $0x60] sm:$0xff]  ;;  %v35_v42 = vld [vmem:[%s3810_s1 + $0x68] sm:$0xff]  ;;  %v102_v44 = vld [vmem:[%s3811_s2 + $0x78] sm:$0xff] }
   0xf   :  { %2240 = vmatmul.mubr.msk.f32.gmra.mxu0 %vm471_vm0, %v27_v18  ;;  %2288 = vmatmul.mubr.msk.f32.gmra.mxu1 %vm471_vm0, %v59_v19  ;;  %v66_v41 = vld [vmem:[%s3810_s1 + $0x160] sm:$0xff]  ;;  %v67_v43 = vld [vmem:[%s3810_s1 + $0x168] sm:$0xff]  ;;  %v101_v45 = vld [vmem:[%s3811_s2 + $0x70] sm:$0xff] }
  0x10   :  { %188 = vperm.xlu1 %2334, %v94_v20   ;;  %183 = vperm.xlu0 %2333, %v93_v21   ;;  %v36_v46 = vld [vmem:[%s3810_s1 + $0x70] sm:$0xff]  ;;  %v37_v48 = vld [vmem:[%s3810_s1 + $0x78] sm:$0xff]  ;;  %v104_v50 = vld [vmem:[%s3811_s2 + $0x88] sm:$0xff] }
  0x11   :  { %2242 = vmatprep.mubr.msk.f32.mxu0 %vm471_vm0, %v28_v22  ;;  %2290 = vmatprep.mubr.msk.f32.mxu1 %vm471_vm0, %v60_v23  ;;  %v68_v47 = vld [vmem:[%s3810_s1 + $0x170] sm:$0xff]  ;;  %v69_v49 = vld [vmem:[%s3810_s1 + $0x178] sm:$0xff]  ;;  %v103_v51 = vld [vmem:[%s3811_s2 + $0x80] sm:$0xff] }
  0x12   :  { %v38_v52 = vld [vmem:[%s3810_s1 + $0x80] sm:$0xff]  ;;  %v39_v54 = vld [vmem:[%s3810_s1 + $0x88] sm:$0xff]  ;;  %v106_v56 = vld [vmem:[%s3811_s2 + $0x98] sm:$0xff] }
  0x13   :  { %2243 = vmatmul.mubr.msk.f32.gmra.mxu0 %vm471_vm0, %v29_v24  ;;  %2291 = vmatmul.mubr.msk.f32.gmra.mxu1 %vm471_vm0, %v61_v25  ;;  %v70_v53 = vld [vmem:[%s3810_s1 + $0x180] sm:$0xff]  ;;  %v71_v55 = vld [vmem:[%s3810_s1 + $0x188] sm:$0xff]  ;;  %v105_v57 = vld [vmem:[%s3811_s2 + $0x90] sm:$0xff] }
  0x14   :  { %198 = vperm.xlu1 %2334, %v96_v26   ;;  %193 = vperm.xlu0 %2333, %v95_v27   ;;  %v40_v58 = vld [vmem:[%s3810_s1 + $0x90] sm:$0xff]  ;;  %v41_v60 = vld [vmem:[%s3810_s1 + $0x98] sm:$0xff]  ;;  %v108_v62 = vld [vmem:[%s3811_s2 + $0xa8] sm:$0xff] }
  0x15   :  { %2245 = vmatprep.mubr.msk.f32.mxu0 %vm471_vm0, %v30_v28  ;;  %2293 = vmatprep.mubr.msk.f32.mxu1 %vm471_vm0, %v62_v29  ;;  %v72_v59 = vld [vmem:[%s3810_s1 + $0x190] sm:$0xff]  ;;  %v73_v61 = vld [vmem:[%s3810_s1 + $0x198] sm:$0xff]  ;;  %v107_v63 = vld [vmem:[%s3811_s2 + $0xa0] sm:$0xff] }
  0x16   :  { %v42_v0 = vld [vmem:[%s3810_s1 + $0xa0] sm:$0xff]  ;;  %v43_v2 = vld [vmem:[%s3810_s1 + $0xa8] sm:$0xff]  ;;  %v110_v4 = vld [vmem:[%s3811_s2 + $0xb8] sm:$0xff] }
  0x17   :  { %2246 = vmatmul.mubr.msk.f32.gmra.mxu0 %vm471_vm0, %v31_v30  ;;  %2294 = vmatmul.mubr.msk.f32.gmra.mxu1 %vm471_vm0, %v63_v31  ;;  %v74_v1 = vld [vmem:[%s3810_s1 + $0x1a0] sm:$0xff]  ;;  %v75_v3 = vld [vmem:[%s3810_s1 + $0x1a8] sm:$0xff]  ;;  %v109_v5 = vld [vmem:[%s3811_s2 + $0xb0] sm:$0xff] }
  0x18   :  { %208 = vperm.xlu1 %2334, %v98_v32   ;;  %203 = vperm.xlu0 %2333, %v97_v33   ;;  %v44_v6 = vld [vmem:[%s3810_s1 + $0xb0] sm:$0xff]  ;;  %v45_v8 = vld [vmem:[%s3810_s1 + $0xb8] sm:$0xff]  ;;  %v112_v10 = vld [vmem:[%s3811_s2 + $0xc8] sm:$0xff] }
  0x19   :  { %2248 = vmatprep.mubr.msk.f32.mxu0 %vm471_vm0, %v32_v34  ;;  %2296 = vmatprep.mubr.msk.f32.mxu1 %vm471_vm0, %v64_v35  ;;  %v76_v7 = vld [vmem:[%s3810_s1 + $0x1b0] sm:$0xff]  ;;  %v77_v9 = vld [vmem:[%s3810_s1 + $0x1b8] sm:$0xff]  ;;  %v111_v11 = vld [vmem:[%s3811_s2 + $0xc0] sm:$0xff] }
  0x1a   :  { %v46_v12 = vld [vmem:[%s3810_s1 + $0xc0] sm:$0xff] }
  0x1b   :  { %2249 = vmatmul.mubr.msk.f32.gmra.mxu0 %vm471_vm0, %v33_v36  ;;  %2297 = vmatmul.mubr.msk.f32.gmra.mxu1 %vm471_vm0, %v65_v37  ;;  %v78_v13 = vld [vmem:[%s3810_s1 + $0x1c0] sm:$0xff] }
  0x1c   :  { %218 = vperm.xlu1 %2334, %v100_v38   ;;  %213 = vperm.xlu0 %2333, %v99_v39  }
  0x1d   :  { %2251 = vmatprep.mubr.msk.f32.mxu0 %vm471_vm0, %v34_v40  ;;  %2299 = vmatprep.mubr.msk.f32.mxu1 %vm471_vm0, %v66_v41 }
  0x1f   :  { %2252 = vmatmul.mubr.msk.f32.gmra.mxu0 %vm471_vm0, %v35_v42  ;;  %2300 = vmatmul.mubr.msk.f32.gmra.mxu1 %vm471_vm0, %v67_v43 }
  0x20   :  { %228 = vperm.xlu1 %2334, %v102_v44   ;;  %223 = vperm.xlu0 %2333, %v101_v45  }
  0x21   :  { %2254 = vmatprep.mubr.msk.f32.mxu0 %vm471_vm0, %v36_v46  ;;  %2302 = vmatprep.mubr.msk.f32.mxu1 %vm471_vm0, %v68_v47 }
  0x23   :  { %2255 = vmatmul.mubr.msk.f32.gmra.mxu0 %vm471_vm0, %v37_v48  ;;  %2303 = vmatmul.mubr.msk.f32.gmra.mxu1 %vm471_vm0, %v69_v49 }
  0x24   :  { %238 = vperm.xlu1 %2334, %v104_v50   ;;  %233 = vperm.xlu0 %2333, %v103_v51  }
  0x25   :  { %2257 = vmatprep.mubr.msk.f32.mxu0 %vm471_vm0, %v38_v52  ;;  %2305 = vmatprep.mubr.msk.f32.mxu1 %vm471_vm0, %v70_v53 }
  0x27   :  { %2258 = vmatmul.mubr.msk.f32.gmra.mxu0 %vm471_vm0, %v39_v54  ;;  %2306 = vmatmul.mubr.msk.f32.gmra.mxu1 %vm471_vm0, %v71_v55 }
  0x28   :  { %248 = vperm.xlu1 %2334, %v106_v56   ;;  %243 = vperm.xlu0 %2333, %v105_v57  }
  0x29   :  { %2260 = vmatprep.mubr.msk.f32.mxu0 %vm471_vm0, %v40_v58  ;;  %2308 = vmatprep.mubr.msk.f32.mxu1 %vm471_vm0, %v72_v59 }
  0x2b   :  { %2261 = vmatmul.mubr.msk.f32.gmra.mxu0 %vm471_vm0, %v41_v60  ;;  %2309 = vmatmul.mubr.msk.f32.gmra.mxu1 %vm471_vm0, %v73_v61 }
  0x2c   :  { %258 = vperm.xlu1 %2334, %v108_v62   ;;  %253 = vperm.xlu0 %2333, %v107_v63  }
  0x2d   :  { %2263 = vmatprep.mubr.msk.f32.mxu0 %vm471_vm0, %v42_v0  ;;  %2311 = vmatprep.mubr.msk.f32.mxu1 %vm471_vm0, %v74_v1 }
  0x2f   :  { %2264 = vmatmul.mubr.msk.f32.gmra.mxu0 %vm471_vm0, %v43_v2  ;;  %2312 = vmatmul.mubr.msk.f32.gmra.mxu1 %vm471_vm0, %v75_v3 }
  0x30   :  { %268 = vperm.xlu1 %2334, %v110_v4   ;;  %263 = vperm.xlu0 %2333, %v109_v5  }
  0x31   :  { %2266 = vmatprep.mubr.msk.f32.mxu0 %vm471_vm0, %v44_v6  ;;  %2314 = vmatprep.mubr.msk.f32.mxu1 %vm471_vm0, %v76_v7 }
  0x33   :  { %2267 = vmatmul.mubr.msk.f32.gmra.mxu0 %vm471_vm0, %v45_v8  ;;  %2315 = vmatmul.mubr.msk.f32.gmra.mxu1 %vm471_vm0, %v77_v9 }
  0x34   :  { %11 = vsyncpa [#allocation4], 0  ;;  %278 = vperm.xlu1 %2334, %v112_v10   ;;  %273 = vperm.xlu0 %2333, %v111_v11   ;;  %v47_v14 = vld [vmem:[%s3810_s1 + $0xc8] sm:$0xff]  ;;  %v114_v16 = vld [vmem:[%s3811_s2 + $0xd8] sm:$0xff]  ;;  %vm1884_vm1 = vcmask 64512   ;;  %s2614_s28 = smov [#allocation3]  }
  0x35   :  { %v79_v15 = vld [vmem:[%s3810_s1 + $0x1c8] sm:$0xff]  ;;  %2269 = vmatprep.mubr.msk.f32.mxu0 %vm471_vm0, %v46_v12  ;;  %2317 = vmatprep.mubr.msk.f32.mxu1 %vm471_vm0, %v78_v13  ;;  %v113_v17 = vld [vmem:[%s3811_s2 + $0xd0] sm:$0xff]  ;;  %v49_v20 = vld [vmem:[%s3810_s1 + $0xd8] sm:$0xff]  ;;  %s2029_s29 = sshll.u32 %s2614_s28, 4  ;;  %vm2021_vm2 = vcmask 57344   ;;  %s2030_s29 = int_to_ptr.vmem [resolvable:$true] %s2029_s29 }
  0x36   :  { %v48_v18 = vld [vmem:[%s3810_s1 + $0xd0] sm:$0xff]  ;;  %v81_v21 = vld [vmem:[%s3810_s1 + $0x1d8] sm:$0xff]  ;;  %v116_v22 = vld [vmem:[%s3811_s2 + $0xe8] sm:$0xff]  ;;  %s2591_s30 = scalar_lea.vmem %s2030_s29, 16  ;;  %s2595_s6 = scalar_lea.vmem %s2030_s29, 32 }
  0x37   :  { %v80_v19 = vld [vmem:[%s3810_s1 + $0x1d0] sm:$0xff]  ;;  %2270 = vmatmul.mubr.msk.f32.gmra.mxu0 %vm471_vm0, %v47_v14  ;;  %2318 = vmatmul.mubr.msk.f32.gmra.mxu1 %vm471_vm0, %v79_v15  ;;  %v115_v23 = vld [vmem:[%s3811_s2 + $0xe0] sm:$0xff]  ;;  %v51_v26 = vld [vmem:[%s3810_s1 + $0xe8] sm:$0xff]  ;;  %p2592_p0 = scmp.ne.s32.totalorder %s2030_s29, %s2591_s30  ;;  %p2596_p1 = scmp.lt.s32.totalorder %s2030_s29, %s2030_s29 }
  0x38   :  { %288 = vperm.xlu1 %2334, %v114_v16   ;;  %283 = vperm.xlu0 %2333, %v113_v17   ;;  %v50_v24 = vld [vmem:[%s3810_s1 + $0xe0] sm:$0xff]  ;;  %v83_v27 = vld [vmem:[%s3810_s1 + $0x1e8] sm:$0xff]  ;;  %v118_v28 = vld [vmem:[%s3811_s2 + $0xf8] sm:$0xff]  ;;  %p2597_p2 = scmp.lt.s32.totalorder %s2595_s6, %s2591_s30 }
  0x39   :  { %2272 = vmatprep.mubr.msk.f32.mxu0 %vm471_vm0, %v48_v18  ;;  %2320 = vmatprep.mubr.msk.f32.mxu1 %vm471_vm0, %v80_v19  ;;  %v82_v25 = vld [vmem:[%s3810_s1 + $0x1e0] sm:$0xff]  ;;  %v117_v29 = vld [vmem:[%s3811_s2 + $0xf0] sm:$0xff]  ;;  %v53_v32 = vld [vmem:[%s3810_s1 + $0xf8] sm:$0xff] }
  0x3a   :  { %v52_v30 = vld [vmem:[%s3810_s1 + $0xf0] sm:$0xff]  ;;  %v85_v33 = vld [vmem:[%s3810_s1 + $0x1f8] sm:$0xff]  ;;  %v120_v34 = vld [vmem:[%s3811_s2 + $0x108] sm:$0xff]  ;;  %p2598_p3 = por %p2597_p2, %p2596_p1 }
  0x3b   :  { %2273 = vmatmul.mubr.msk.f32.gmra.mxu0 %vm471_vm0, %v49_v20  ;;  %2321 = vmatmul.mubr.msk.f32.gmra.mxu1 %vm471_vm0, %v81_v21  ;;  %v84_v31 = vld [vmem:[%s3810_s1 + $0x1f0] sm:$0xff]  ;;  %v119_v35 = vld [vmem:[%s3811_s2 + $0x100] sm:$0xff]  ;;  %v122_v36 = vld [vmem:[%s3811_s2 + $0x118] sm:$0xff] }
  0x3c   :  { %298 = vperm.xlu1 %2334, %v116_v22   ;;  %293 = vperm.xlu0 %2333, %v115_v23   ;;  %v121_v37 = vld [vmem:[%s3811_s2 + $0x110] sm:$0xff]  ;;  %v124_v38 = vld [vmem:[%s3811_s2 + $0x128] sm:$0xff]  ;;  %v123_v39 = vld [vmem:[%s3811_s2 + $0x120] sm:$0xff]  ;;  %p2599_p4 = pnand %p2598_p3, %p2592_p0 }
  0x3d   :  { %2275 = vmatprep.mubr.msk.f32.mxu0 %vm471_vm0, %v50_v24  ;;  %2323 = vmatprep.mubr.msk.f32.mxu1 %vm471_vm0, %v82_v25  ;;  %v126_v40 = vld [vmem:[%s3811_s2 + $0x138] sm:$0xff]  ;;  %v125_v41 = vld [vmem:[%s3811_s2 + $0x130] sm:$0xff]  ;;  %v128_v42 = vld [vmem:[%s3811_s2 + $0x148] sm:$0xff] }
  0x3e   :  { %v127_v43 = vld [vmem:[%s3811_s2 + $0x140] sm:$0xff]  ;;  %v130_v44 = vld [vmem:[%s3811_s2 + $0x158] sm:$0xff]  ;;  %v129_v45 = vld [vmem:[%s3811_s2 + $0x150] sm:$0xff] }
  0x3f   :  { %2276 = vmatmul.mubr.msk.f32.gmra.mxu0 %vm471_vm0, %v51_v26  ;;  %2324 = vmatmul.mubr.msk.f32.gmra.mxu1 %vm471_vm0, %v83_v27  ;;  %v132_v46 = vld [vmem:[%s3811_s2 + $0x168] sm:$0xff]  ;;  %v131_v47 = vld [vmem:[%s3811_s2 + $0x160] sm:$0xff]  ;;  %v134_v48 = vld [vmem:[%s3811_s2 + $0x178] sm:$0xff] }
  0x40   :  { %308 = vperm.xlu1 %2334, %v118_v28   ;;  %303 = vperm.xlu0 %2333, %v117_v29   ;;  %v133_v49 = vld [vmem:[%s3811_s2 + $0x170] sm:$0xff]  ;;  %v136_v50 = vld [vmem:[%s3811_s2 + $0x188] sm:$0xff]  ;;  %v135_v51 = vld [vmem:[%s3811_s2 + $0x180] sm:$0xff] }
  0x41   :  { %2278 = vmatprep.mubr.msk.f32.mxu0 %vm471_vm0, %v52_v30  ;;  %2326 = vmatprep.mubr.msk.f32.mxu1 %vm471_vm0, %v84_v31  ;;  %v138_v52 = vld [vmem:[%s3811_s2 + $0x198] sm:$0xff]  ;;  %v137_v53 = vld [vmem:[%s3811_s2 + $0x190] sm:$0xff]  ;;  %v140_v54 = vld [vmem:[%s3811_s2 + $0x1a8] sm:$0xff] }
  0x42   :  { %v139_v55 = vld [vmem:[%s3811_s2 + $0x1a0] sm:$0xff]  ;;  %v142_v56 = vld [vmem:[%s3811_s2 + $0x1b8] sm:$0xff]  ;;  %v141_v57 = vld [vmem:[%s3811_s2 + $0x1b0] sm:$0xff] }
  0x43   :  { %2279 = vmatmul.mubr.msk.f32.gmra.mxu0 %vm471_vm0, %v53_v32  ;;  %2327 = vmatmul.mubr.msk.f32.gmra.mxu1 %vm471_vm0, %v85_v33  ;;  %v144_v58 = vld [vmem:[%s3811_s2 + $0x1c8] sm:$0xff]  ;;  %v143_v59 = vld [vmem:[%s3811_s2 + $0x1c0] sm:$0xff]  ;;  %v146_v60 = vld [vmem:[%s3811_s2 + $0x1d8] sm:$0xff] }
  0x44   :  { %318 = vperm.xlu1 %2334, %v120_v34   ;;  %313 = vperm.xlu0 %2333, %v119_v35   ;;  %v145_v61 = vld [vmem:[%s3811_s2 + $0x1d0] sm:$0xff]  ;;  %v148_v62 = vld [vmem:[%s3811_s2 + $0x1e8] sm:$0xff]  ;;  %v147_v63 = vld [vmem:[%s3811_s2 + $0x1e0] sm:$0xff] }
  0x45   :  { %v150_v0 = vld [vmem:[%s3811_s2 + $0x1f8] sm:$0xff]  ;;  %v149_v1 = vld [vmem:[%s3811_s2 + $0x1f0] sm:$0xff]  ;;  %v1437_v4 = vld [vmem:[%s3812_s3 + $0x8] sm:$0xff] }
  0x46   :  { %v1436_v5 = vld [vmem:[%s3812_s3] sm:$0xff]  ;;  %v1439_v8 = vld [vmem:[%s3812_s3 + $0x18] sm:$0xff]  ;;  %v1438_v9 = vld [vmem:[%s3812_s3 + $0x10] sm:$0xff] }
  0x47   :  { %v1441_v12 = vld [vmem:[%s3812_s3 + $0x28] sm:$0xff]  ;;  %v1440_v13 = vld [vmem:[%s3812_s3 + $0x20] sm:$0xff]  ;;  %v1443_v16 = vld [vmem:[%s3812_s3 + $0x38] sm:$0xff] }
  0x48   :  { %328 = vperm.xlu1 %2334, %v122_v36   ;;  %323 = vperm.xlu0 %2333, %v121_v37   ;;  %v1442_v17 = vld [vmem:[%s3812_s3 + $0x30] sm:$0xff]  ;;  %v1445_v20 = vld [vmem:[%s3812_s3 + $0x48] sm:$0xff]  ;;  %v1444_v21 = vld [vmem:[%s3812_s3 + $0x40] sm:$0xff] }
  0x49   :  { %v1447_v24 = vld [vmem:[%s3812_s3 + $0x58] sm:$0xff]  ;;  %v1446_v25 = vld [vmem:[%s3812_s3 + $0x50] sm:$0xff]  ;;  %v1449_v28 = vld [vmem:[%s3812_s3 + $0x68] sm:$0xff] }
  0x4a   :  { %v1448_v29 = vld [vmem:[%s3812_s3 + $0x60] sm:$0xff]  ;;  %v1451_v32 = vld [vmem:[%s3812_s3 + $0x78] sm:$0xff]  ;;  %v1450_v33 = vld [vmem:[%s3812_s3 + $0x70] sm:$0xff] }
  0x4b   :  { %v1453_v36 = vld [vmem:[%s3812_s3 + $0x88] sm:$0xff]  ;;  %v1452_v37 = vld [vmem:[%s3812_s3 + $0x80] sm:$0xff] }
  0x4c   :  { %338 = vperm.xlu1 %2334, %v124_v38   ;;  %333 = vperm.xlu0 %2333, %v123_v39  }
  0x50   :  { %348 = vperm.xlu1 %2334, %v126_v40   ;;  %343 = vperm.xlu0 %2333, %v125_v41   ;;  %v1455_v40 = vld [vmem:[%s3812_s3 + $0x98] sm:$0xff]  ;;  %v1454_v41 = vld [vmem:[%s3812_s3 + $0x90] sm:$0xff] }
  0x54   :  { %358 = vperm.xlu1 %2334, %v128_v42   ;;  %353 = vperm.xlu0 %2333, %v127_v43  }
  0x58   :  { %368 = vperm.xlu1 %2334, %v130_v44   ;;  %363 = vperm.xlu0 %2333, %v129_v45   ;;  %v1457_v44 = vld [vmem:[%s3812_s3 + $0xa8] sm:$0xff]  ;;  %v1456_v45 = vld [vmem:[%s3812_s3 + $0xa0] sm:$0xff] }
  0x5c   :  { %378 = vperm.xlu1 %2334, %v132_v46   ;;  %373 = vperm.xlu0 %2333, %v131_v47  }
  0x60   :  { %388 = vperm.xlu1 %2334, %v134_v48   ;;  %383 = vperm.xlu0 %2333, %v133_v49   ;;  %v1459_v48 = vld [vmem:[%s3812_s3 + $0xb8] sm:$0xff]  ;;  %v1458_v49 = vld [vmem:[%s3812_s3 + $0xb0] sm:$0xff] }
  0x64   :  { %398 = vperm.xlu1 %2334, %v136_v50   ;;  %393 = vperm.xlu0 %2333, %v135_v51  }
  0x68   :  { %408 = vperm.xlu1 %2334, %v138_v52   ;;  %403 = vperm.xlu0 %2333, %v137_v53   ;;  %v1461_v52 = vld [vmem:[%s3812_s3 + $0xc8] sm:$0xff]  ;;  %v1460_v53 = vld [vmem:[%s3812_s3 + $0xc0] sm:$0xff] }
  0x6c   :  { %418 = vperm.xlu1 %2334, %v140_v54   ;;  %413 = vperm.xlu0 %2333, %v139_v55  }
  0x70   :  { %428 = vperm.xlu1 %2334, %v142_v56   ;;  %423 = vperm.xlu0 %2333, %v141_v57   ;;  %v1463_v56 = vld [vmem:[%s3812_s3 + $0xd8] sm:$0xff]  ;;  %v1462_v57 = vld [vmem:[%s3812_s3 + $0xd0] sm:$0xff] }
  0x74   :  { %438 = vperm.xlu1 %2334, %v144_v58   ;;  %433 = vperm.xlu0 %2333, %v143_v59  }
  0x78   :  { %448 = vperm.xlu1 %2334, %v146_v60   ;;  %443 = vperm.xlu0 %2333, %v145_v61   ;;  %v1465_v60 = vld [vmem:[%s3812_s3 + $0xe8] sm:$0xff]  ;;  %v1464_v61 = vld [vmem:[%s3812_s3 + $0xe0] sm:$0xff] }
  0x7c   :  { %458 = vperm.xlu1 %2334, %v148_v62   ;;  %453 = vperm.xlu0 %2333, %v147_v63  }
  0x7e   :  { %v3100_v2 = vpop.permute.xlu1 %163  ;;  %v3102_v3 = vpop.permute.xlu0 %153 }
  0x80   :  { %468 = vperm.xlu1 %2334, %v150_v0   ;;  %463 = vperm.xlu0 %2333, %v149_v1   ;;  %v1467_v0 = vld [vmem:[%s3812_s3 + $0xf8] sm:$0xff]  ;;  %v1466_v1 = vld [vmem:[%s3812_s3 + $0xf0] sm:$0xff] }
  0x83   :  { %v3110_v6 = vpop.permute.xlu1 %168  ;;  %v3112_v7 = vpop.permute.xlu0 %158 }
  0x84   :  { %1507 = vperm.xlu1 %2334, %v1437_v4   ;;  %1502 = vperm.xlu0 %2333, %v1436_v5  }
  0x87   :  { %v3120_v10 = vpop.permute.xlu1 %178  ;;  %v3122_v11 = vpop.permute.xlu0 %173 }
  0x88   :  { %1517 = vperm.xlu1 %2334, %v1439_v8   ;;  %1512 = vperm.xlu0 %2333, %v1438_v9   ;;  %v1469_v8 = vld [vmem:[%s3812_s3 + $0x108] sm:$0xff]  ;;  %v1468_v9 = vld [vmem:[%s3812_s3 + $0x100] sm:$0xff] }
  0x8b   :  { %v3130_v14 = vpop.permute.xlu1 %188  ;;  %v3132_v15 = vpop.permute.xlu0 %183 }
  0x8c   :  { %1527 = vperm.xlu1 %2334, %v1441_v12   ;;  %1522 = vperm.xlu0 %2333, %v1440_v13  }
  0x8f   :  { %v3140_v18 = vpop.permute.xlu1 %198  ;;  %v3142_v19 = vpop.permute.xlu0 %193 }
  0x90   :  { %1537 = vperm.xlu1 %2334, %v1443_v16   ;;  %1532 = vperm.xlu0 %2333, %v1442_v17   ;;  %v1471_v16 = vld [vmem:[%s3812_s3 + $0x118] sm:$0xff]  ;;  %v1470_v17 = vld [vmem:[%s3812_s3 + $0x110] sm:$0xff] }
  0x93   :  { %v3150_v22 = vpop.permute.xlu1 %208  ;;  %v3152_v23 = vpop.permute.xlu0 %203 }
  0x94   :  { %1547 = vperm.xlu1 %2334, %v1445_v20   ;;  %1542 = vperm.xlu0 %2333, %v1444_v21  }
  0x97   :  { %v3160_v26 = vpop.permute.xlu1 %218  ;;  %v3162_v27 = vpop.permute.xlu0 %213 }
  0x98   :  { %1557 = vperm.xlu1 %2334, %v1447_v24   ;;  %1552 = vperm.xlu0 %2333, %v1446_v25   ;;  %v1473_v25 = vld [vmem:[%s3812_s3 + $0x128] sm:$0xff] }
  0x9b   :  { %v3170_v30 = vpop.permute.xlu1 %228  ;;  %v3172_v31 = vpop.permute.xlu0 %223 }
  0x9c   :  { %1567 = vperm.xlu1 %2334, %v1449_v28   ;;  %1562 = vperm.xlu0 %2333, %v1448_v29   ;;  %v1472_v28 = vld [vmem:[%s3812_s3 + $0x120] sm:$0xff] }
  0x9f   :  { %v3180_v34 = vpop.permute.xlu1 %238  ;;  %v3182_v35 = vpop.permute.xlu0 %233 }
  0xa0   :  { %1577 = vperm.xlu1 %2334, %v1451_v32   ;;  %1572 = vperm.xlu0 %2333, %v1450_v33  }
  0xa3   :  { %v3190_v38 = vpop.permute.xlu1 %248  ;;  %v3192_v39 = vpop.permute.xlu0 %243 }
  0xa4   :  { %1587 = vperm.xlu1 %2334, %v1453_v36   ;;  %1582 = vperm.xlu0 %2333, %v1452_v37   ;;  %v1475_v37 = vld [vmem:[%s3812_s3 + $0x138] sm:$0xff] }
  0xa7   :  { %v3200_v42 = vpop.permute.xlu1 %258  ;;  %v3202_v43 = vpop.permute.xlu0 %253 }
  0xa8   :  { %1597 = vperm.xlu1 %2334, %v1455_v40   ;;  %1592 = vperm.xlu0 %2333, %v1454_v41   ;;  %v1474_v40 = vld [vmem:[%s3812_s3 + $0x130] sm:$0xff] }
  0xab   :  { %v3210_v46 = vpop.permute.xlu1 %268  ;;  %v3212_v47 = vpop.permute.xlu0 %263 }
  0xac   :  { %1607 = vperm.xlu1 %2334, %v1457_v44   ;;  %1602 = vperm.xlu0 %2333, %v1456_v45  }
  0xaf   :  { %v3220_v50 = vpop.permute.xlu1 %278  ;;  %v3222_v51 = vpop.permute.xlu0 %273 }
  0xb0   :  { %1617 = vperm.xlu1 %2334, %v1459_v48   ;;  %1612 = vperm.xlu0 %2333, %v1458_v49   ;;  %v1477_v49 = vld [vmem:[%s3812_s3 + $0x148] sm:$0xff] }
  0xb3   :  { %v3230_v54 = vpop.permute.xlu1 %288  ;;  %v3232_v55 = vpop.permute.xlu0 %283 }
  0xb4   :  { %1627 = vperm.xlu1 %2334, %v1461_v52   ;;  %1622 = vperm.xlu0 %2333, %v1460_v53   ;;  %v1476_v52 = vld [vmem:[%s3812_s3 + $0x140] sm:$0xff] }
  0xb7   :  { %v3240_v58 = vpop.permute.xlu1 %298  ;;  %v3242_v59 = vpop.permute.xlu0 %293 }
  0xb8   :  { %1637 = vperm.xlu1 %2334, %v1463_v56   ;;  %1632 = vperm.xlu0 %2333, %v1462_v57  }
  0xbb   :  { %v3250_v62 = vpop.permute.xlu1 %308  ;;  %v3252_v63 = vpop.permute.xlu0 %303 }
  0xbc   :  { %1647 = vperm.xlu1 %2334, %v1465_v60   ;;  %1642 = vperm.xlu0 %2333, %v1464_v61  }
  0xbf   :  { %v3260_v4 = vpop.permute.xlu1 %318  ;;  %v3262_v5 = vpop.permute.xlu0 %313 }
  0xc0   :  { %1657 = vperm.xlu1 %2334, %v1467_v0   ;;  %1652 = vperm.xlu0 %2333, %v1466_v1   ;;  %v1479_v0 = vld [vmem:[%s3812_s3 + $0x158] sm:$0xff]  ;;  %v1478_v1 = vld [vmem:[%s3812_s3 + $0x150] sm:$0xff] }
  0xc3   :  { %v3270_v12 = vpop.permute.xlu1 %328  ;;  %v3272_v13 = vpop.permute.xlu0 %323 }
  0xc4   :  { %1667 = vperm.xlu1 %2334, %v1469_v8   ;;  %1662 = vperm.xlu0 %2333, %v1468_v9  }
  0xc7   :  { %v3280_v20 = vpop.permute.xlu1 %338  ;;  %v3282_v21 = vpop.permute.xlu0 %333 }
  0xc8   :  { %v2235_v24 = vpop.f32.mrf.mxu0  ;;  %1677 = vperm.xlu1 %2334, %v1471_v16   ;;  %1672 = vperm.xlu0 %2333, %v1470_v17  }
  0xc9   :  { %v739_v61 = vadd.f32 %v2235_v24, %v3112_v7  ;;  %v1481_v7 = vld [vmem:[%s3812_s3 + $0x168] sm:$0xff]  ;;  %v1480_v24 = vld [vmem:[%s3812_s3 + $0x160] sm:$0xff] }
  0xca   :  { %v733_v29 = vpop.f32.mrf.mxu0 }
  0xcb   :  { %v3290_v32 = vpop.permute.xlu1 %348  ;;  %v3292_v33 = vpop.permute.xlu0 %343  ;;  %v734_v8 = vadd.f32 %v733_v29, %v3102_v3 }
  0xcc   :  { %v2238_v36 = vpop.f32.mrf.mxu0  ;;  %1687 = vperm.xlu1 %2334, %v1473_v25   ;;  %1682 = vperm.xlu0 %2333, %v1472_v28   ;;  %v2103_v28 = vmul.f32 -1.442695, %v739_v61  ;;  %v1483_v61 = vld [vmem:[%s3812_s3 + $0x178] sm:$0xff] }
  0xce   :  { %v743_v41 = vpop.f32.mrf.mxu0  ;;  %2335 = vpow2.f32 %v2103_v28 }
  0xcf   :  { %v3300_v44 = vpop.permute.xlu1 %358  ;;  %v3302_v45 = vpop.permute.xlu0 %353 }
  0xd0   :  { %v2241_v48 = vpop.f32.mrf.mxu0  ;;  %1697 = vperm.xlu1 %2334, %v1475_v37   ;;  %1692 = vperm.xlu0 %2333, %v1474_v40   ;;  %v2102_v37 = vmul.f32 -1.442695, %v734_v8 }
  0xd2   :  { %v753_v53 = vpop.f32.mrf.mxu0  ;;  %2337 = vpow2.f32 %v2102_v37  ;;  %v759_v37 = vadd.f32 %v2241_v48, %v3120_v10  ;;  %v1486_v10 = vld [vmem:[%s3812_s3 + $0x190] sm:$0xff] }
  0xd3   :  { %v3310_v56 = vpop.permute.xlu1 %368  ;;  %v3312_v57 = vpop.permute.xlu0 %363 }
  0xd4   :  { %3815 = vst [vmem:[#allocation6_spill] sm:$0xff] %v3310_v56  ;;  %3816 = vst [vmem:[#allocation7_spill] sm:$0xff] %v3312_v57  ;;  %v2244_v60 = vpop.f32.mrf.mxu0  ;;  %1707 = vperm.xlu1 %2334, %v1477_v49   ;;  %1702 = vperm.xlu0 %2333, %v1476_v52   ;;  %v749_v52 = vadd.f32 %v2238_v36, %v3110_v6  ;;  %v1485_v6 = vld [vmem:[%s3812_s3 + $0x188] sm:$0xff]  ;;  %v1484_v36 = vld [vmem:[%s3812_s3 + $0x180] sm:$0xff]  ;;  %v2107_v48 = vmul.f32 -1.442695, %v759_v37 }
  0xd6   :  { %v763_v9 = vpop.f32.mrf.mxu0  ;;  %v2105_v28 = vmul.f32 -1.442695, %v749_v52 }
  0xd7   :  { %v3322_v16 = vpop.permute.xlu1 %378  ;;  %v3324_v17 = vpop.permute.xlu0 %373  ;;  %v764_v52 = vadd.f32 %v763_v9, %v3132_v15 }
  0xd8   :  { %3817 = vst [vmem:[#allocation8_spill] sm:$0xff] %v3322_v16  ;;  %3818 = vst [vmem:[#allocation9_spill] sm:$0xff] %v3324_v17  ;;  %v2247_v25 = vpop.f32.mrf.mxu0  ;;  %1717 = vperm.xlu1 %2334, %v1479_v0   ;;  %1712 = vperm.xlu0 %2333, %v1478_v1   ;;  %v1482_v0 = vld [vmem:[%s3812_s3 + $0x170] sm:$0xff]  ;;  %v744_v1 = vadd.f32 %v743_v41, %v3100_v2  ;;  %2339 = vpow2.f32 %v2105_v28 }
  0xd9   :  { %v2108_v9 = vmul.f32 -1.442695, %v764_v52 }
  0xda   :  { %v773_v40 = vpop.f32.mrf.mxu0 }
  0xdb   :  { %v3332_v3 = vpop.permute.xlu1 %388  ;;  %v3334_v29 = vpop.permute.xlu0 %383  ;;  %v774_v28 = vadd.f32 %v773_v40, %v3142_v19 }
  0xdc   :  { %3819 = vst [vmem:[#allocation10_spill] sm:$0xff] %v3332_v3  ;;  %3820 = vst [vmem:[#allocation11_spill] sm:$0xff] %v3334_v29  ;;  %v3336_v49 = vpop.f32.mrf.mxu0  ;;  %1727 = vperm.xlu1 %2334, %v1481_v7   ;;  %1722 = vperm.xlu0 %2333, %v1480_v24   ;;  %v2104_v24 = vmul.f32 -1.442695, %v744_v1  ;;  %v769_v1 = vadd.f32 %v2244_v60, %v3130_v14  ;;  %v2336_v14 = vpop.eup %2335 }
  0xdd   :  { %v3388_v40 = vpop.f32.mrf.mxu1  ;;  %v2110_v52 = vmul.f32 -1.442695, %v774_v28 }
  0xde   :  { %v783_v7 = vpop.f32.mrf.mxu0  ;;  %2341 = vpow2.f32 %v2104_v24  ;;  %v1488_v24 = vld [vmem:[%s3812_s3 + $0x1a0] sm:$0xff]  ;;  %v2109_v37 = vmul.f32 -1.442695, %v769_v1 }
  0xdf   :  { %v3346_v8 = vpop.permute.xlu1 %398  ;;  %v3348_v29 = vpop.permute.xlu0 %393  ;;  %2343 = vpow2.f32 %v2107_v48 }
  0xe0   :  { %3821 = vst [vmem:[#allocation12_spill] sm:$0xff] %v3346_v8  ;;  %3822 = vst [vmem:[#allocation13_spill] sm:$0xff] %v3348_v29  ;;  %1737 = vperm.xlu1 %2334, %v1483_v61   ;;  %1732 = vperm.xlu0 %2333, %v1482_v0   ;;  %v754_v29 = vadd.f32 %v753_v53, %v3122_v11  ;;  %v3362_v61 = vpop.f32.mrf.mxu0  ;;  %v1487_v0 = vld [vmem:[%s3812_s3 + $0x198] sm:$0xff]  ;;  %v2338_v60 = vpop.eup %2337 }
  0xe1   :  { %v1244_v48 = vadd.f32 1.0, %v2338_v60  ;;  %v3405_v28 = vpop.f32.mrf.mxu1 }
  0xe2   :  { %v793_v15 = vpop.f32.mrf.mxu0 }
  0xe3   :  { %v3357_v2 = vpop.permute.xlu1 %408  ;;  %v3359_v41 = vpop.permute.xlu0 %403 }
  0xe4   :  { %3823 = vst [vmem:[#allocation14_spill] sm:$0xff] %v3357_v2  ;;  %3824 = vst [vmem:[#allocation15_spill] sm:$0xff] %v3359_v41  ;;  %1747 = vperm.xlu1 %2334, %v1485_v6   ;;  %1742 = vperm.xlu0 %2333, %v1484_v36   ;;  %v2106_v6 = vmul.f32 -1.442695, %v754_v29  ;;  %v1489_v36 = vld [vmem:[%s3812_s3 + $0x1a8] sm:$0xff]  ;;  %v779_v29 = vadd.f32 %v2247_v25, %v3140_v18  ;;  %v1491_v18 = vld [vmem:[%s3812_s3 + $0x1b8] sm:$0xff] }
  0xe5   :  { %v1490_v25 = vld [vmem:[%s3812_s3 + $0x1b0] sm:$0xff] }
  0xe6   :  { %2345 = vpow2.f32 %v2106_v6  ;;  %v2111_v1 = vmul.f32 -1.442695, %v779_v29 }
  0xe7   :  { %v3372_v11 = vpop.permute.xlu1 %418  ;;  %v3374_v53 = vpop.permute.xlu0 %413  ;;  %2347 = vpow2.f32 %v2108_v9 }
  0xe8   :  { %3825 = vst [vmem:[#allocation16_spill] sm:$0xff] %v3372_v11  ;;  %3826 = vst [vmem:[#allocation17_spill] sm:$0xff] %v3374_v53  ;;  %1757 = vperm.xlu1 %2334, %v1487_v0   ;;  %1752 = vperm.xlu0 %2333, %v1486_v10   ;;  %v784_v0 = vadd.f32 %v783_v7, %v3152_v23  ;;  %v3391_v10 = vpop.f32.mrf.mxu0  ;;  %v1245_v53 = vadd.f32 1.0, %v2336_v14  ;;  %2349 = vpow2.f32 %v2109_v37  ;;  %v1493_v14 = vld [vmem:[%s3812_s3 + $0x1c8] sm:$0xff] }
  0xe9   :  { %v789_v23 = vadd.f32 %v3336_v49, %v3150_v22  ;;  %2351 = vpow2.f32 %v2110_v52  ;;  %v1492_v22 = vld [vmem:[%s3812_s3 + $0x1c0] sm:$0xff]  ;;  %v2340_v49 = vpop.eup %2339 }
  0xea   :  { %v2112_v9 = vmul.f32 -1.442695, %v784_v0  ;;  %2353 = vrcp.f32 %v1245_v53  ;;  %v799_v53 = vadd.f32 %v3362_v61, %v3160_v26 }
  0xeb   :  { %v3384_v11 = vpop.permute.xlu1 %428  ;;  %v3386_v19 = vpop.permute.xlu0 %423  ;;  %2355 = vrcp.f32 %v1244_v48  ;;  %v2113_v37 = vmul.f32 -1.442695, %v789_v23  ;;  %v1495_v48 = vld [vmem:[%s3812_s3 + $0x1d8] sm:$0xff] }
  0xec   :  { %3827 = vst [vmem:[#allocation18_spill] sm:$0xff] %v3384_v11  ;;  %3828 = vst [vmem:[#allocation19_spill] sm:$0xff] %v3386_v19  ;;  %1767 = vperm.xlu1 %2334, %v1489_v36   ;;  %1762 = vperm.xlu0 %2333, %v1488_v24   ;;  %v794_v36 = vadd.f32 %v793_v15, %v3162_v27  ;;  %v803_v24 = vpop.f32.mrf.mxu0  ;;  %v2342_v60 = vpop.eup %2341  ;;  %2357 = vpow2.f32 %v2111_v1  ;;  %v1494_v1 = vld [vmem:[%s3812_s3 + $0x1d0] sm:$0xff] }
  0xed   :  { %v3418_v15 = vpop.f32.mrf.mxu1  ;;  %2359 = vpow2.f32 %v2112_v9  ;;  %v1246_v23 = vadd.f32 1.0, %v2342_v60  ;;  %v2344_v61 = vpop.eup %2343  ;;  %v1496_v60 = vld [vmem:[%s3812_s3 + $0x1e0] sm:$0xff] }
  0xee   :  { %v2114_v52 = vmul.f32 -1.442695, %v794_v36  ;;  %v3422_v0 = vpop.f32.mrf.mxu0  ;;  %2361 = vpow2.f32 %v2113_v37 }
  0xef   :  { %v3401_v7 = vpop.permute.xlu1 %438  ;;  %v3403_v6 = vpop.permute.xlu0 %433 }
  0xf0   :  { %3829 = vst [vmem:[#allocation20_spill] sm:$0xff] %v3401_v7  ;;  %3830 = vst [vmem:[#allocation21_spill] sm:$0xff] %v3403_v6  ;;  %1777 = vperm.xlu1 %2334, %v1491_v18   ;;  %1772 = vperm.xlu0 %2333, %v1490_v25   ;;  %v1247_v18 = vadd.f32 1.0, %v2340_v49  ;;  %v804_v25 = vadd.f32 %v803_v24, %v3172_v31  ;;  %v3435_v36 = vpop.f32.mrf.mxu1  ;;  %2363 = vpow2.f32 %v2114_v52  ;;  %v3437_v31 = vpop.f32.mrf.mxu0  ;;  %v1497_v49 = vld [vmem:[%s3812_s3 + $0x1e8] sm:$0xff] }
  0xf2   :  { %2365 = vrcp.f32 %v1247_v18 }
  0xf3   :  { %v3414_v29 = vpop.permute.xlu1 %448  ;;  %v3416_v27 = vpop.permute.xlu0 %443  ;;  %2367 = vrcp.f32 %v1246_v23  ;;  %v1499_v23 = vld [vmem:[%s3812_s3 + $0x1f8] sm:$0xff] }
  0xf4   :  { %3831 = vst [vmem:[#allocation22_spill] sm:$0xff] %v3414_v29  ;;  %3832 = vst [vmem:[#allocation23_spill] sm:$0xff] %v3416_v27  ;;  %1787 = vperm.xlu1 %2334, %v1493_v14   ;;  %1782 = vperm.xlu0 %2333, %v1492_v22   ;;  %v2115_v14 = vmul.f32 -1.442695, %v799_v53  ;;  %v2346_v24 = vpop.eup %2345  ;;  %v2116_v22 = vmul.f32 -1.442695, %v804_v25  ;;  %v3451_v25 = vpop.f32.mrf.mxu0  ;;  %v809_v27 = vadd.f32 %v3391_v10, %v3170_v30 }
  0xf5   :  { %v2348_v37 = vpop.eup %2347  ;;  %v1248_v18 = vadd.f32 1.0, %v2346_v24 }
  0xf6   :  { %2369 = vpow2.f32 %v2115_v14  ;;  %v1250_v29 = vadd.f32 1.0, %v2348_v37  ;;  %v823_v10 = vpop.f32.mrf.mxu0  ;;  %v2117_v7 = vmul.f32 -1.442695, %v809_v27 }
  0xf7   :  { %v3431_v9 = vpop.permute.xlu1 %458  ;;  %v3433_v26 = vpop.permute.xlu0 %453  ;;  %2371 = vpow2.f32 %v2116_v22 }
  0xf8   :  { %3833 = vst [vmem:[#allocation24_spill] sm:$0xff] %v3431_v9  ;;  %3834 = vst [vmem:[#allocation25_spill] sm:$0xff] %v3433_v26  ;;  %1797 = vperm.xlu1 %2334, %v1495_v48   ;;  %1792 = vperm.xlu0 %2333, %v1494_v1   ;;  %v1249_v9 = vadd.f32 1.0, %v2344_v61  ;;  %v2350_v48 = vpop.eup %2349  ;;  %v3449_v1 = vpop.f32.mrf.mxu1  ;;  %v1498_v61 = vld [vmem:[%s3812_s3 + $0x1f0] sm:$0xff] }
  0xf9   :  { %v2352_v26 = vpop.eup %2351  ;;  %v3465_v8 = vpop.f32.mrf.mxu0 }
  0xfa   :  { %v2354_v24 = vpop.eup %2353  ;;  %2373 = vrcp.f32 %v1249_v9  ;;  %v3461_v37 = vpop.f32.mrf.mxu1  ;;  %v1252_v30 = vadd.f32 1.0, %v2352_v26 }
  0xfb   :  { %v3445_v53 = vpop.permute.xlu1 %468  ;;  %v3447_v52 = vpop.permute.xlu0 %463  ;;  %2375 = vrcp.f32 %v1248_v18 }
  0xfc   :  { %3835 = vst [vmem:[#allocation26_spill] sm:$0xff] %v3445_v53  ;;  %3836 = vst [vmem:[#allocation27_spill] sm:$0xff] %v3447_v52  ;;  %1807 = vperm.xlu1 %2334, %v1497_v49   ;;  %1802 = vperm.xlu0 %2333, %v1496_v60   ;;  %v2356_v14 = vpop.eup %2355  ;;  %v1251_v53 = vadd.f32 1.0, %v2350_v48  ;;  %2377 = vrcp.f32 %v1250_v29  ;;  %v3463_v2 = vpop.f32.mrf.mxu1  ;;  %v819_v29 = vadd.f32 %v3422_v0, %v3180_v34 }
  0xfd   :  { %v2358_v52 = vpop.eup %2357 }
  0xfe   :  { %v2360_v22 = vpop.eup %2359  ;;  %2379 = vrcp.f32 %v1251_v53  ;;  %v1253_v19 = vadd.f32 1.0, %v2358_v52  ;;  %v2119_v3 = vmul.f32 -1.442695, %v819_v29 }
  0xff   :  { %v1508_v49 = vpop.permute.xlu1 %1507  ;;  %v1503_v60 = vpop.permute.xlu0 %1502  ;;  %2381 = vrcp.f32 %v1252_v30  ;;  %v1254_v18 = vadd.f32 1.0, %v2360_v22 }
 0x100   :  { %1817 = vperm.xlu1 %2334, %v1499_v23   ;;  %1812 = vperm.xlu0 %2333, %v1498_v61   ;;  %v1821_v6 = vmul.f32 %v2354_v24, %v1508_v49  ;;  %v1820_v11 = vmul.f32 %v2356_v14, %v1503_v60  ;;  %v2362_v41 = vpop.eup %2361  ;;  %2383 = vpow2.f32 %v2117_v7  ;;  %v814_v24 = vadd.f32 %v3437_v31, %v3182_v35  ;;  %v3473_v60 = vpop.f32.mrf.mxu1 }
 0x101   :  { %v2364_v26 = vpop.eup %2363  ;;  %2385 = vrcp.f32 %v1253_v19  ;;  %v1255_v61 = vadd.f32 1.0, %v2362_v41  ;;  %v833_v30 = vpop.f32.mrf.mxu0  ;;  %v824_v19 = vadd.f32 %v823_v10, %v3192_v39 }
 0x102   :  { %v2366_v27 = vpop.eup %2365  ;;  %v1886_v23 = vsel %vm1884_vm1, %v1821_v6, 0.0  ;;  %v1885_v53 = vsel %vm1884_vm1, %v1820_v11, 0.0  ;;  %2387 = vrcp.f32 %v1254_v18  ;;  %v1256_v7 = vadd.f32 1.0, %v2364_v26  ;;  %v3477_v56 = vpop.f32.mrf.mxu1 }
 0x103   :  { %v1518_v9 = vpop.permute.xlu1 %1517  ;;  %v1513_v48 = vpop.permute.xlu0 %1512  ;;  %v1887_v6 = vadd.f32 %v1886_v23, %v1885_v53  ;;  %2389 = vrcp.f32 %v1255_v61  ;;  %v2118_v41 = vmul.f32 -1.442695, %v814_v24  ;;  %v834_v61 = vadd.f32 %v833_v30, %v3202_v43 }
 0x104   :  { %v2368_v52 = vpop.eup %2367  ;;  %v1823_v22 = vmul.f32 %v2366_v27, %v1518_v9  ;;  %2391 = vrcp.f32 %v1256_v7  ;;  %v3479_v9 = vpop.f32.mrf.mxu0  ;;  %v829_v27 = vadd.f32 %v3451_v25, %v3190_v38 }
 0x105   :  { %v1822_v34 = vmul.f32 %v2368_v52, %v1513_v48  ;;  %v2370_v0 = vpop.eup %2369  ;;  %2393 = vpow2.f32 %v2119_v3  ;;  %v2120_v52 = vmul.f32 -1.442695, %v824_v19 }
 0x106   :  { %v2372_v17 = vpop.eup %2371  ;;  %v1257_v18 = vadd.f32 1.0, %v2370_v0  ;;  %v1890_v48 = vsel %vm1884_vm1, %v1823_v22, 0.0  ;;  %2395 = vpow2.f32 %v2118_v41  ;;  %v899_v22 = vadd.f32 %v3388_v40, %v3260_v4  ;;  %v843_v3 = vpop.f32.mrf.mxu0 }
 0x107   :  { %v1528_v14 = vpop.permute.xlu1 %1527  ;;  %v1523_v49 = vpop.permute.xlu0 %1522  ;;  %v1888_v11 = vsel %vm1884_vm1, %v1822_v34, 0.0  ;;  %v1258_v29 = vadd.f32 1.0, %v2372_v17 }
 0x108   :  { %v1889_v35 = vadd.f32 %v1888_v11, %v1887_v6  ;;  %v2374_v57 = vpop.eup %2373  ;;  %v3487_v17 = vpop.f32.mrf.mxu1  ;;  %2397 = vrcp.f32 %v1257_v18  ;;  %v2122_v11 = vmul.f32 -1.442695, %v834_v61 }
 0x109   :  { %v2376_v26 = vpop.eup %2375  ;;  %v1825_v10 = vmul.f32 %v2374_v57, %v1528_v14  ;;  %2399 = vrcp.f32 %v1258_v29  ;;  %v2121_v57 = vmul.f32 -1.442695, %v829_v27 }
 0x10a   :  { %v1891_v23 = vadd.f32 %v1890_v48, %v1889_v35  ;;  %v2378_v39 = vpop.eup %2377  ;;  %v1824_v53 = vmul.f32 %v2376_v26, %v1523_v49  ;;  %2401 = vpow2.f32 %v2120_v52  ;;  %v2135_v35 = vmul.f32 -1.442695, %v899_v22  ;;  %v3492_v18 = vpop.f32.mrf.mxu1 }
 0x10b   :  { %v1538_v31 = vpop.permute.xlu1 %1537  ;;  %v1533_v16 = vpop.permute.xlu0 %1532  ;;  %v1894_v43 = vsel %vm1884_vm1, %v1825_v10, 0.0  ;;  %v839_v48 = vadd.f32 %v3465_v8, %v3200_v42  ;;  %2403 = vpow2.f32 %v2121_v57  ;;  %v894_v42 = vadd.f32 %v3405_v28, %v3262_v5 }
 0x10c   :  { %v1826_v24 = vmul.f32 %v2378_v39, %v1533_v16  ;;  %v2380_v0 = vpop.eup %2379  ;;  %v1892_v38 = vsel %vm1884_vm1, %v1824_v53, 0.0  ;;  %v3496_v26 = vpop.f32.mrf.mxu0  ;;  %2405 = vpow2.f32 %v2122_v11 }
 0x10d   :  { %v2382_v25 = vpop.eup %2381  ;;  %v1893_v14 = vadd.f32 %v1892_v38, %v1891_v23  ;;  %v1827_v16 = vmul.f32 %v2380_v0, %v1538_v31  ;;  %v844_v31 = vadd.f32 %v843_v3, %v3212_v47  ;;  %2407 = vpow2.f32 %v2135_v35  ;;  %v3503_v8 = vpop.f32.mrf.mxu1 }
 0x10e   :  { %v2384_v49 = vpop.eup %2383  ;;  %v1896_v30 = vsel %vm1884_vm1, %v1826_v24, 0.0  ;;  %v2123_v22 = vmul.f32 -1.442695, %v839_v48  ;;  %v3505_v47 = vpop.f32.mrf.mxu0  ;;  %v2134_v11 = vmul.f32 -1.442695, %v894_v42 }
 0x10f   :  { %v1548_v7 = vpop.permute.xlu1 %1547  ;;  %v1543_v34 = vpop.permute.xlu0 %1542  ;;  %v1895_v4 = vadd.f32 %v1894_v43, %v1893_v14  ;;  %v1259_v27 = vadd.f32 1.0, %v2384_v49  ;;  %v1898_v39 = vsel %vm1884_vm1, %v1827_v16, 0.0  ;;  %v2124_v38 = vmul.f32 -1.442695, %v844_v31 }
 0x110   :  { %v1828_v6 = vmul.f32 %v2382_v25, %v1543_v34  ;;  %v2386_v19 = vpop.eup %2385 }
 0x111   :  { %v2388_v29 = vpop.eup %2387  ;;  %v1897_v23 = vadd.f32 %v1896_v30, %v1895_v4  ;;  %v1829_v10 = vmul.f32 %v2386_v19, %v1548_v7  ;;  %v909_v7 = vadd.f32 %v3418_v15, %v3270_v12  ;;  %2409 = vrcp.f32 %v1259_v27  ;;  %v3511_v4 = vpop.f32.mrf.mxu1 }
 0x112   :  { %v1900_v53 = vsel %vm1884_vm1, %v1828_v6, 0.0  ;;  %v2390_v0 = vpop.eup %2389  ;;  %2411 = vpow2.f32 %v2123_v22  ;;  %v849_v12 = vadd.f32 %v3479_v9, %v3210_v46  ;;  %v3515_v15 = vpop.f32.mrf.mxu0  ;;  %v929_v22 = vadd.f32 %v3463_v2, %v3290_v32 }
 0x113   :  { %v1558_v40 = vpop.permute.xlu1 %1557  ;;  %v1553_v41 = vpop.permute.xlu0 %1552  ;;  %v1899_v61 = vadd.f32 %v1898_v39, %v1897_v23  ;;  %v1902_v14 = vsel %vm1884_vm1, %v1829_v10, 0.0  ;;  %v2137_v27 = vmul.f32 -1.442695, %v909_v7  ;;  %2413 = vpow2.f32 %v2124_v38 }
 0x114   :  { %v1830_v52 = vmul.f32 %v2388_v29, %v1553_v41  ;;  %v2392_v3 = vpop.eup %2391  ;;  %v1831_v49 = vmul.f32 %v2390_v0, %v1558_v40  ;;  %v904_v40 = vadd.f32 %v3435_v36, %v3272_v13  ;;  %v919_v39 = vadd.f32 %v3449_v1, %v3280_v20 }
 0x115   :  { %v1901_v25 = vadd.f32 %v1900_v53, %v1899_v61  ;;  %v2394_v57 = vpop.eup %2393  ;;  %v914_v36 = vadd.f32 %v3461_v37, %v3282_v21  ;;  %v2125_v61 = vmul.f32 -1.442695, %v849_v12  ;;  %v859_v2 = vadd.f32 %v3496_v26, %v3220_v50 }
 0x116   :  { %v1904_v43 = vsel %vm1884_vm1, %v1830_v52, 0.0  ;;  %v2396_v6 = vpop.eup %2395  ;;  %v1261_v19 = vadd.f32 1.0, %v2394_v57  ;;  %v1906_v31 = vsel %vm1884_vm1, %v1831_v49, 0.0  ;;  %v3529_v52 = vpop.f32.mrf.mxu1  ;;  %v924_v57 = vadd.f32 %v3473_v60, %v3292_v33 }
 0x117   :  { %v1568_v24 = vpop.permute.xlu1 %1567  ;;  %v1563_v34 = vpop.permute.xlu0 %1562  ;;  %v1903_v5 = vadd.f32 %v1902_v14, %v1901_v25  ;;  %v1260_v35 = vadd.f32 1.0, %v2396_v6  ;;  %v2138_v25 = vmul.f32 -1.442695, %v914_v36  ;;  %v2141_v6 = vmul.f32 -1.442695, %v929_v22 }
 0x118   :  { %v1832_v16 = vmul.f32 %v2392_v3, %v1563_v34  ;;  %v2398_v41 = vpop.eup %2397  ;;  %v863_v34 = vpop.f32.mrf.mxu0  ;;  %v2139_v3 = vmul.f32 -1.442695, %v919_v39  ;;  %v854_v33 = vadd.f32 %v3505_v47, %v3222_v51 }
 0x119   :  { %v1905_v48 = vadd.f32 %v1904_v43, %v1903_v5  ;;  %v2400_v29 = vpop.eup %2399  ;;  %2415 = vrcp.f32 %v1260_v35  ;;  %v1833_v46 = vmul.f32 %v2398_v41, %v1568_v24  ;;  %v2136_v24 = vmul.f32 -1.442695, %v904_v40  ;;  %v3540_v14 = vpop.f32.mrf.mxu1 }
 0x11a   :  { %v1908_v23 = vsel %vm1884_vm1, %v1832_v16, 0.0  ;;  %v2402_v13 = vpop.eup %2401  ;;  %2417 = vpow2.f32 %v2134_v11  ;;  %v2277_v49 = vpop.f32.mrf.mxu0  ;;  %v2140_v40 = vmul.f32 -1.442695, %v924_v57  ;;  %v864_v51 = vadd.f32 %v863_v34, %v3232_v55 }
 0x11b   :  { %v1578_v28 = vpop.permute.xlu1 %1577  ;;  %v1573_v30 = vpop.permute.xlu0 %1572  ;;  %v1907_v9 = vadd.f32 %v1906_v31, %v1905_v48  ;;  %2419 = vrcp.f32 %v1261_v19  ;;  %v1262_v0 = vadd.f32 1.0, %v2402_v13  ;;  %v1910_v7 = vsel %vm1884_vm1, %v1833_v46, 0.0 }
 0x11c   :  { %v1834_v20 = vmul.f32 %v2400_v29, %v1573_v30  ;;  %v2404_v1 = vpop.eup %2403  ;;  %2421 = vpow2.f32 %v2137_v27  ;;  %v3551_v19 = vpop.f32.mrf.mxu1  ;;  %v2127_v48 = vmul.f32 -1.442695, %v859_v2  ;;  %v869_v29 = vadd.f32 %v3515_v15, %v3230_v54 }
 0x11d   :  { %v1909_v42 = vadd.f32 %v1908_v23, %v1907_v9  ;;  %2423 = vrcp.f32 %v1262_v0  ;;  %v2406_v37 = vpop.eup %2405  ;;  %v1263_v32 = vadd.f32 1.0, %v2404_v1  ;;  %v873_v50 = vpop.f32.mrf.mxu0  ;;  %v879_v55 = vadd.f32 %v2277_v49, %v3240_v58 }
 0x11e   :  { %2425 = vpow2.f32 %v2125_v61  ;;  %v2408_v16 = vpop.eup %2407  ;;  %v1912_v5 = vsel %vm1884_vm1, %v1834_v20, 0.0  ;;  %v1264_v11 = vadd.f32 1.0, %v2406_v37  ;;  %v3561_v9 = vpop.f32.mrf.mxu1  ;;  %v2129_v61 = vmul.f32 -1.442695, %v869_v29 }
 0x11f   :  { %v3523_v10 = vpop.permute.xlu1 %1587  ;;  %v3525_v53 = vpop.permute.xlu0 %1582  ;;  %v1911_v43 = vadd.f32 %v1910_v7, %v1909_v42  ;;  %2427 = vpow2.f32 %v2136_v24  ;;  %v1277_v27 = vadd.f32 1.0, %v2408_v16  ;;  %v2128_v20 = vmul.f32 -1.442695, %v864_v51 }
 0x120   :  { %v2410_v30 = vpop.eup %2409  ;;  %2429 = vpow2.f32 %v2139_v3  ;;  %v2280_v36 = vpop.f32.mrf.mxu0  ;;  %v874_v24 = vadd.f32 %v873_v50, %v3242_v59  ;;  %v2131_v16 = vmul.f32 -1.442695, %v879_v55 }
 0x121   :  { %v1835_v60 = vmul.f32 %v2410_v30, %v1578_v28  ;;  %2431 = vpow2.f32 %v2138_v25  ;;  %v1913_v26 = vadd.f32 %v1912_v5, %v1911_v43  ;;  %v2412_v35 = vpop.eup %2411  ;;  %v2126_v28 = vmul.f32 -1.442695, %v854_v33  ;;  %v3572_v57 = vpop.f32.mrf.mxu1 }
 0x122   :  { %2433 = vrcp.f32 %v1263_v32  ;;  %v2414_v47 = vpop.eup %2413  ;;  %v1265_v13 = vadd.f32 1.0, %v2412_v35  ;;  %v889_v59 = vadd.f32 %v2280_v36, %v3250_v62  ;;  %v2130_v5 = vmul.f32 -1.442695, %v874_v24 }
 0x123   :  { %v3534_v38 = vpop.permute.xlu1 %1597  ;;  %v3536_v21 = vpop.permute.xlu0 %1592  ;;  %2435 = vpow2.f32 %v2141_v6  ;;  %v1914_v31 = vsel %vm1884_vm1, %v1835_v60, 0.0  ;;  %v1266_v42 = vadd.f32 1.0, %v2414_v47  ;;  %v939_v62 = vadd.f32 %v3477_v56, %v3300_v44 }
 0x124   :  { %2437 = vrcp.f32 %v1264_v11  ;;  %v1915_v54 = vadd.f32 %v1914_v31, %v1913_v26  ;;  %v2133_v35 = vmul.f32 -1.442695, %v889_v59 }
 0x125   :  { %2439 = vpow2.f32 %v2140_v40 }
 0x126   :  { %v2416_v46 = vpop.eup %2415  ;;  %2441 = vpow2.f32 %v2127_v48 }
 0x127   :  { %v3547_v12 = vpop.permute.xlu1 %1607  ;;  %v3549_v41 = vpop.permute.xlu0 %1602  ;;  %v1836_v34 = vmul.f32 %v2416_v46, %v3525_v53  ;;  %2443 = vrcp.f32 %v1277_v27  ;;  %v2143_v46 = vmul.f32 -1.442695, %v939_v62 }
 0x128   :  { %v2418_v15 = vpop.eup %2417  ;;  %2445 = vpow2.f32 %v2126_v28  ;;  %v883_v53 = vpop.f32.mrf.mxu0 }
 0x129   :  { %v2420_v0 = vpop.eup %2419  ;;  %v1916_v3 = vsel %vm1884_vm1, %v1836_v34, 0.0  ;;  %v1276_v58 = vadd.f32 1.0, %v2418_v15  ;;  %2447 = vrcp.f32 %v1265_v13  ;;  %v884_v30 = vadd.f32 %v883_v53, %v3252_v63 }
 0x12a   :  { %v2422_v1 = vpop.eup %2421  ;;  %v1837_v22 = vmul.f32 %v2420_v0, %v3523_v10  ;;  %v1917_v49 = vadd.f32 %v1916_v3, %v1915_v54  ;;  %2449 = vpow2.f32 %v2129_v61  ;;  %v934_v63 = vadd.f32 %v3487_v17, %v3302_v45  ;;  %v3837_v45 = vld [vmem:[#allocation6_spill] sm:$0xff]  ;;  %v3838_v61 = vld [vmem:[#allocation7_spill] sm:$0xff] }
 0x12b   :  { %v3557_v23 = vpop.permute.xlu1 %1617  ;;  %v3559_v39 = vpop.permute.xlu0 %1612  ;;  %v1279_v32 = vadd.f32 1.0, %v2422_v1  ;;  %2451 = vrcp.f32 %v1266_v42  ;;  %v2132_v44 = vmul.f32 -1.442695, %v884_v30  ;;  %v949_v17 = vadd.f32 %v3492_v18, %v3837_v45  ;;  %v3839_v42 = vld [vmem:[#allocation8_spill] sm:$0xff] }
 0x12c   :  { %v2424_v25 = vpop.eup %2423  ;;  %2453 = vpow2.f32 %v2128_v20  ;;  %v1918_v6 = vsel %vm1884_vm1, %v1837_v22, 0.0  ;;  %v2142_v15 = vmul.f32 -1.442695, %v934_v63  ;;  %v944_v55 = vadd.f32 %v3503_v8, %v3838_v61 }
 0x12d   :  { %v2426_v43 = vpop.eup %2425  ;;  %v1838_v10 = vmul.f32 %v2424_v25, %v3536_v21  ;;  %2455 = vrcp.f32 %v1276_v58  ;;  %v3586_v21 = vpop.f32.mrf.mxu1  ;;  %v1919_v50 = vadd.f32 %v1918_v6, %v1917_v49  ;;  %v959_v18 = vadd.f32 %v3511_v4, %v3839_v42  ;;  %v3840_v25 = vld [vmem:[#allocation9_spill] sm:$0xff] }
 0x12e   :  { %v2428_v2 = vpop.eup %2427  ;;  %v1267_v40 = vadd.f32 1.0, %v2426_v43  ;;  %2457 = vpow2.f32 %v2131_v16  ;;  %v2145_v8 = vmul.f32 -1.442695, %v949_v17  ;;  %v2144_v4 = vmul.f32 -1.442695, %v944_v55 }
 0x12f   :  { %v3568_v7 = vpop.permute.xlu1 %1627  ;;  %v3570_v37 = vpop.permute.xlu0 %1622  ;;  %v1920_v48 = vsel %vm1884_vm1, %v1838_v10, 0.0  ;;  %2459 = vrcp.f32 %v1279_v32  ;;  %v1278_v27 = vadd.f32 1.0, %v2428_v2  ;;  %v2147_v32 = vmul.f32 -1.442695, %v959_v18 }
 0x130   :  { %v3582_v60 = vpop.eup %2429  ;;  %2461 = vpow2.f32 %v2130_v5  ;;  %v3602_v13 = vpop.f32.mrf.mxu1  ;;  %v1921_v36 = vadd.f32 %v1920_v48, %v1919_v50 }
 0x131   :  { %v3588_v26 = vpop.eup %2431  ;;  %2463 = vrcp.f32 %v1267_v40  ;;  %v3841_v40 = vld [vmem:[#allocation10_spill] sm:$0xff] }
 0x132   :  { %v2434_v29 = vpop.eup %2433  ;;  %2465 = vpow2.f32 %v2133_v35  ;;  %v3620_v58 = vpop.f32.mrf.mxu1  ;;  %v969_v50 = vadd.f32 %v3540_v14, %v3841_v40 }
 0x133   :  { %v3578_v11 = vpop.permute.xlu1 %1637  ;;  %v3580_v33 = vpop.permute.xlu0 %1632  ;;  %v1839_v56 = vmul.f32 %v2434_v29, %v3534_v38  ;;  %v3842_v29 = vld [vmem:[#allocation11_spill] sm:$0xff] }
 0x134   :  { %v3593_v51 = vpop.eup %2435  ;;  %2467 = vrcp.f32 %v1278_v27  ;;  %v3630_v63 = vpop.f32.mrf.mxu1  ;;  %v964_v27 = vadd.f32 %v3551_v19, %v3842_v29 }
 0x135   :  { %v2438_v31 = vpop.eup %2437  ;;  %2469 = vpow2.f32 %v2132_v44  ;;  %v1922_v1 = vsel %vm1884_vm1, %v1839_v56, 0.0 }
 0x136   :  { %v3604_v54 = vpop.eup %2439  ;;  %v1840_v38 = vmul.f32 %v2438_v31, %v3549_v41  ;;  %2471 = vpow2.f32 %v2143_v46  ;;  %v954_v41 = vadd.f32 %v3529_v52, %v3840_v25  ;;  %v1923_v53 = vadd.f32 %v1922_v1, %v1921_v36  ;;  %v3644_v61 = vpop.f32.mrf.mxu1 }
 0x137   :  { %v3596_v47 = vpop.permute.xlu1 %1647  ;;  %v3598_v28 = vpop.permute.xlu0 %1642  ;;  %v1281_v25 = vadd.f32 1.0, %v3582_v60 }
 0x138   :  { %v2442_v34 = vpop.eup %2441  ;;  %2473 = vpow2.f32 %v2142_v15  ;;  %v1924_v16 = vsel %vm1884_vm1, %v1840_v38, 0.0  ;;  %v2146_v62 = vmul.f32 -1.442695, %v954_v41  ;;  %v2149_v15 = vmul.f32 -1.442695, %v969_v50  ;;  %v3843_v41 = vld [vmem:[#allocation12_spill] sm:$0xff] }
 0x139   :  { %v3609_v0 = vpop.eup %2443  ;;  %v1269_v20 = vadd.f32 1.0, %v2442_v34  ;;  %v1925_v35 = vadd.f32 %v1924_v16, %v1923_v53  ;;  %v979_v53 = vadd.f32 %v3561_v9, %v3843_v41  ;;  %v1282_v9 = vadd.f32 1.0, %v3604_v54  ;;  %v3845_v50 = vld [vmem:[#allocation14_spill] sm:$0xff] }
 0x13a   :  { %v2446_v3 = vpop.eup %2445 }
 0x13b   :  { %v3614_v24 = vpop.permute.xlu1 %1657  ;;  %v3616_v22 = vpop.permute.xlu0 %1652  ;;  %v1268_v43 = vadd.f32 1.0, %v2446_v3  ;;  %2475 = vrcp.f32 %v1269_v20 }
 0x13c   :  { %v2448_v49 = vpop.eup %2447 }
 0x13d   :  { %v2450_v59 = vpop.eup %2449  ;;  %2477 = vrcp.f32 %v1268_v43  ;;  %v1841_v5 = vmul.f32 %v2448_v49, %v3547_v12  ;;  %v3655_v49 = vpop.f32.mrf.mxu1 }
 0x13e   :  { %v2452_v10 = vpop.eup %2451  ;;  %v1271_v2 = vadd.f32 1.0, %v2450_v59  ;;  %2479 = vpow2.f32 %v2145_v8  ;;  %v1280_v59 = vadd.f32 1.0, %v3588_v26  ;;  %v2151_v26 = vmul.f32 -1.442695, %v979_v53 }
 0x13f   :  { %v3624_v30 = vpop.permute.xlu1 %1667  ;;  %v3626_v52 = vpop.permute.xlu0 %1662  ;;  %2481 = vpow2.f32 %v2144_v4  ;;  %v1842_v44 = vmul.f32 %v2452_v10, %v3559_v39  ;;  %v1926_v14 = vsel %vm1884_vm1, %v1841_v5, 0.0  ;;  %v2148_v39 = vmul.f32 -1.442695, %v964_v27 }
 0x140   :  { %v2454_v6 = vpop.eup %2453  ;;  %2483 = vrcp.f32 %v1271_v2  ;;  %v1927_v19 = vadd.f32 %v1926_v14, %v1925_v35  ;;  %v3844_v2 = vld [vmem:[#allocation13_spill] sm:$0xff]  ;;  %v989_v35 = vadd.f32 %v3586_v21, %v3845_v50  ;;  %v3669_v29 = vpop.f32.mrf.mxu1 }
 0x141   :  { %v3632_v48 = vpop.eup %2455  ;;  %v1270_v12 = vadd.f32 1.0, %v2454_v6  ;;  %v1928_v34 = vsel %vm1884_vm1, %v1842_v44, 0.0  ;;  %v974_v60 = vadd.f32 %v3572_v57, %v3844_v2 }
 0x142   :  { %v2458_v56 = vpop.eup %2457  ;;  %v1929_v4 = vadd.f32 %v1928_v34, %v1927_v19  ;;  %v3846_v19 = vld [vmem:[#allocation15_spill] sm:$0xff] }
 0x143   :  { %v3637_v31 = vpop.eup %2459  ;;  %2485 = vrcp.f32 %v1270_v12  ;;  %v1273_v46 = vadd.f32 1.0, %v2458_v56  ;;  %v3640_v45 = vpop.permute.xlu1 %1677  ;;  %v2150_v44 = vmul.f32 -1.442695, %v974_v60 }
 0x144   :  { %v3642_v17 = vpop.permute.xlu0 %1672  ;;  %v2462_v36 = vpop.eup %2461  ;;  %2487 = vpow2.f32 %v2147_v32  ;;  %v1283_v32 = vadd.f32 1.0, %v3593_v51 }
 0x145   :  { %v2464_v55 = vpop.eup %2463  ;;  %2489 = vpow2.f32 %v2146_v62  ;;  %v1272_v38 = vadd.f32 1.0, %v2462_v36 }
 0x146   :  { %v2466_v42 = vpop.eup %2465  ;;  %2491 = vrcp.f32 %v1273_v46  ;;  %v1843_v1 = vmul.f32 %v2464_v55, %v3557_v23  ;;  %v984_v55 = vadd.f32 %v3602_v13, %v3846_v19 }
 0x147   :  { %v3647_v18 = vpop.eup %2467  ;;  %2493 = vrcp.f32 %v1272_v38  ;;  %v1275_v20 = vadd.f32 1.0, %v2466_v42  ;;  %v3657_v43 = vpop.permute.xlu1 %1687 }
 0x148   :  { %v3650_v3 = vpop.permute.xlu0 %1682  ;;  %v2470_v8 = vpop.eup %2469  ;;  %2495 = vpow2.f32 %v2149_v15  ;;  %v1930_v6 = vsel %vm1884_vm1, %v1843_v1, 0.0  ;;  %v2153_v15 = vmul.f32 -1.442695, %v989_v35 }
 0x149   :  { %v2472_v16 = vpop.eup %2471  ;;  %2497 = vpow2.f32 %v2148_v39  ;;  %v1274_v10 = vadd.f32 1.0, %v2470_v8  ;;  %v1931_v51 = vadd.f32 %v1930_v6, %v1929_v4  ;;  %v3678_v39 = vpop.f32.mrf.mxu1 }
 0x14a   :  { %v2474_v23 = vpop.eup %2473  ;;  %2499 = vrcp.f32 %v1275_v20  ;;  %v1285_v14 = vadd.f32 1.0, %v2472_v16 }
 0x14b   :  { %v2476_v5 = vpop.eup %2475  ;;  %2501 = vrcp.f32 %v1274_v10  ;;  %v3673_v56 = vpop.permute.xlu1 %1697  ;;  %v1284_v34 = vadd.f32 1.0, %v2474_v23  ;;  %v3847_v10 = vld [vmem:[#allocation17_spill] sm:$0xff] }
 0x14c   :  { %v3665_v62 = vpop.permute.xlu0 %1692  ;;  %v2478_v40 = vpop.eup %2477  ;;  %2503 = vrcp.f32 %v1281_v25  ;;  %v1845_v57 = vmul.f32 %v2476_v5, %v3568_v7  ;;  %v994_v23 = vadd.f32 %v3630_v63, %v3847_v10 }
 0x14d   :  { %v2480_v27 = vpop.eup %2479  ;;  %2505 = vrcp.f32 %v1280_v59  ;;  %v1844_v54 = vmul.f32 %v2478_v40, %v3570_v37  ;;  %v2152_v59 = vmul.f32 -1.442695, %v984_v55  ;;  %v3849_v55 = vld [vmem:[#allocation19_spill] sm:$0xff] }
 0x14e   :  { %v2482_v12 = vpop.eup %2481  ;;  %2507 = vrcp.f32 %v1283_v32  ;;  %v1934_v42 = vsel %vm1884_vm1, %v1845_v57, 0.0  ;;  %v1287_v25 = vadd.f32 1.0, %v2480_v27  ;;  %v3688_v32 = vpop.f32.mrf.mxu1  ;;  %v3848_v57 = vld [vmem:[#allocation16_spill] sm:$0xff] }
 0x14f   :  { %v2484_v46 = vpop.eup %2483  ;;  %2509 = vrcp.f32 %v1282_v9  ;;  %v1932_v36 = vsel %vm1884_vm1, %v1844_v54, 0.0  ;;  %v1286_v13 = vadd.f32 1.0, %v2482_v12  ;;  %v3690_v2 = vpop.permute.xlu1 %1707  ;;  %v999_v54 = vadd.f32 %v3620_v58, %v3848_v57 }
 0x150   :  { %v2486_v21 = vpop.eup %2485  ;;  %2511 = vpow2.f32 %v2151_v26  ;;  %v1933_v7 = vadd.f32 %v1932_v36, %v1931_v51  ;;  %v3680_v37 = vpop.permute.xlu0 %1702  ;;  %v1847_v20 = vmul.f32 %v2484_v46, %v3578_v11  ;;  %v2154_v12 = vmul.f32 -1.442695, %v994_v23  ;;  %v3851_v23 = vld [vmem:[#allocation21_spill] sm:$0xff] }
 0x151   :  { %v2488_v38 = vpop.eup %2487  ;;  %v1846_v1 = vmul.f32 %v2486_v21, %v3580_v33  ;;  %2513 = vpow2.f32 %v2150_v44  ;;  %v1852_v21 = vmul.f32 %v3632_v48, %v3626_v52  ;;  %v2155_v52 = vmul.f32 -1.442695, %v999_v54 }
 0x152   :  { %v2490_v8 = vpop.eup %2489  ;;  %v1935_v41 = vadd.f32 %v1934_v42, %v1933_v7  ;;  %2515 = vrcp.f32 %v1285_v14  ;;  %v1938_v60 = vsel %vm1884_vm1, %v1847_v20, 0.0  ;;  %v1289_v40 = vadd.f32 1.0, %v2488_v38  ;;  %v3850_v20 = vld [vmem:[#allocation18_spill] sm:$0xff] }
 0x153   :  { %v2492_v53 = vpop.eup %2491  ;;  %v1936_v4 = vsel %vm1884_vm1, %v1846_v1, 0.0  ;;  %2517 = vpow2.f32 %v2153_v15  ;;  %v1288_v35 = vadd.f32 1.0, %v2490_v8  ;;  %v1004_v7 = vadd.f32 %v3655_v49, %v3849_v55  ;;  %v3707_v38 = vpop.permute.xlu1 %1717  ;;  %v3854_v55 = vld [vmem:[#allocation22_spill] sm:$0xff] }
 0x154   :  { %v2494_v16 = vpop.eup %2493  ;;  %v1937_v11 = vadd.f32 %v1936_v4, %v1935_v41  ;;  %2519 = vrcp.f32 %v1284_v34  ;;  %v1849_v5 = vmul.f32 %v2492_v53, %v3596_v47  ;;  %v3695_v50 = vpop.permute.xlu0 %1712  ;;  %v1853_v53 = vmul.f32 %v3609_v0, %v3624_v30 }
 0x155   :  { %v2496_v33 = vpop.eup %2495  ;;  %v1848_v9 = vmul.f32 %v2494_v16, %v3598_v28  ;;  %2521 = vrcp.f32 %v1287_v25  ;;  %v1023_v47 = vpop.f32.mrf.mxu1  ;;  %v2156_v4 = vmul.f32 -1.442695, %v1004_v7  ;;  %v1029_v7 = vadd.f32 %v3688_v32, %v3854_v55 }
 0x156   :  { %v2498_v6 = vpop.eup %2497  ;;  %v1939_v26 = vadd.f32 %v1938_v60, %v1937_v11  ;;  %2523 = vrcp.f32 %v1286_v13  ;;  %v1942_v46 = vsel %vm1884_vm1, %v1849_v5, 0.0  ;;  %v1291_v19 = vadd.f32 1.0, %v2496_v33 }
 0x157   :  { %v2500_v63 = vpop.eup %2499  ;;  %v1940_v51 = vsel %vm1884_vm1, %v1848_v9, 0.0  ;;  %2525 = vpow2.f32 %v2152_v59  ;;  %v1290_v42 = vadd.f32 1.0, %v2498_v6  ;;  %v3714_v48 = vpop.f32.mrf.mxu1  ;;  %v1948_v13 = vsel %vm1884_vm1, %v1852_v21, 0.0 }
 0x158   :  { %v2502_v27 = vpop.eup %2501  ;;  %v1941_v44 = vadd.f32 %v1940_v51, %v1939_v26  ;;  %v1851_v14 = vmul.f32 %v2500_v63, %v3614_v24  ;;  %2527 = vrcp.f32 %v1289_v40  ;;  %v1009_v24 = vadd.f32 %v3644_v61, %v3850_v20  ;;  %v3716_v25 = vpop.permute.xlu0 %1722  ;;  %v3852_v63 = vld [vmem:[#allocation20_spill] sm:$0xff] }
 0x159   :  { %v2504_v28 = vpop.eup %2503  ;;  %v1850_v36 = vmul.f32 %v2502_v27, %v3616_v22  ;;  %2529 = vrcp.f32 %v1288_v35  ;;  %v1854_v61 = vmul.f32 %v3647_v18, %v3642_v17  ;;  %v1014_v11 = vadd.f32 %v3678_v39, %v3851_v23  ;;  %v1033_v5 = vpop.f32.mrf.mxu1  ;;  %v3857_v23 = vld [vmem:[#allocation27_spill] sm:$0xff] }
 0x15a   :  { %v2506_v15 = vpop.eup %2505  ;;  %v1943_v58 = vadd.f32 %v1942_v46, %v1941_v44  ;;  %2531 = vpow2.f32 %v2154_v12  ;;  %v1946_v41 = vsel %vm1884_vm1, %v1851_v14, 0.0  ;;  %v2157_v10 = vmul.f32 -1.442695, %v1009_v24  ;;  %v3728_v30 = vpop.permute.xlu1 %1727  ;;  %v3853_v12 = vld [vmem:[#allocation23_spill] sm:$0xff]  ;;  %v3855_v24 = vld [vmem:[#allocation25_spill] sm:$0xff] }
 0x15b   :  { %v3709_v34 = vpop.eup %2507  ;;  %v1944_v22 = vsel %vm1884_vm1, %v1850_v36, 0.0  ;;  %2533 = vrcp.f32 %v1291_v19  ;;  %v1950_v17 = vsel %vm1884_vm1, %v1853_v53, 0.0  ;;  %v1855_v18 = vmul.f32 %v3637_v31, %v3640_v45  ;;  %v2328_v46 = vpop.f32.mrf.mxu1 }
 0x15c   :  { %v2510_v1 = vpop.eup %2509  ;;  %v1945_v8 = vadd.f32 %v1944_v22, %v1943_v58  ;;  %2535 = vrcp.f32 %v1290_v42  ;;  %v1952_v6 = vsel %vm1884_vm1, %v1854_v61, 0.0  ;;  %v1856_v40 = vmul.f32 %v2506_v15, %v3650_v3  ;;  %v3737_v27 = vpop.permute.xlu0 %1732  ;;  %v3856_v61 = vld [vmem:[#allocation24_spill] sm:$0xff] }
 0x15d   :  { %v2512_v49 = vpop.eup %2511  ;;  %2537 = vpow2.f32 %v2155_v52  ;;  %v1019_v35 = vadd.f32 %v3669_v29, %v3852_v63  ;;  %v2158_v54 = vmul.f32 -1.442695, %v1014_v11  ;;  %v1024_v44 = vadd.f32 %v1023_v47, %v3853_v12 }
 0x15e   :  { %v1947_v16 = vadd.f32 %v1946_v41, %v1945_v8  ;;  %v2514_v59 = vpop.eup %2513  ;;  %v1293_v60 = vadd.f32 1.0, %v2512_v49  ;;  %2539 = vpow2.f32 %v2156_v4  ;;  %v1954_v36 = vsel %vm1884_vm1, %v1855_v18, 0.0  ;;  %v3748_v58 = vpop.permute.xlu1 %1737 }
 0x15f   :  { %v3726_v33 = vpop.eup %2515  ;;  %v1292_v39 = vadd.f32 1.0, %v2514_v59  ;;  %2541 = vpow2.f32 %v2157_v10  ;;  %v1857_v21 = vmul.f32 %v2504_v28, %v3657_v43  ;;  %v1956_v29 = vsel %vm1884_vm1, %v1856_v40, 0.0  ;;  %v1043_v28 = vpop.f32.mrf.mxu1 }
 0x160   :  { %v1949_v0 = vadd.f32 %v1948_v13, %v1947_v16  ;;  %v2518_v9 = vpop.eup %2517  ;;  %2543 = vrcp.f32 %v1293_v60  ;;  %v1858_v15 = vmul.f32 %v2510_v1, %v3665_v62  ;;  %v2159_v19 = vmul.f32 -1.442695, %v1019_v35  ;;  %v3753_v62 = vpop.permute.xlu0 %1742 }
 0x161   :  { %v2520_v26 = vpop.eup %2519  ;;  %v1295_v45 = vadd.f32 1.0, %v2518_v9  ;;  %2545 = vrcp.f32 %v1292_v39  ;;  %v2160_v20 = vmul.f32 -1.442695, %v1024_v44  ;;  %v1034_v22 = vadd.f32 %v1033_v5, %v3855_v24  ;;  %v3858_v39 = vld [vmem:[#allocation26_spill] sm:$0xff] }
 0x162   :  { %v1951_v51 = vadd.f32 %v1950_v17, %v1949_v0  ;;  %v3739_v57 = vpop.eup %2521  ;;  %2547 = vpow2.f32 %v2158_v54  ;;  %v1958_v49 = vsel %vm1884_vm1, %v1857_v21, 0.0  ;;  %v1859_v32 = vmul.f32 %v3709_v34, %v3673_v56  ;;  %v3763_v56 = vpop.permute.xlu1 %1747 }
 0x163   :  { %v2524_v31 = vpop.eup %2523  ;;  %2549 = vrcp.f32 %v1295_v45  ;;  %v1960_v41 = vsel %vm1884_vm1, %v1858_v15, 0.0  ;;  %v1860_v53 = vmul.f32 %v2520_v26, %v3680_v37  ;;  %v2161_v13 = vmul.f32 -1.442695, %v1029_v7 }
 0x164   :  { %v1953_v3 = vadd.f32 %v1952_v6, %v1951_v51  ;;  %v2526_v14 = vpop.eup %2525  ;;  %2551 = vpow2.f32 %v2159_v19  ;;  %v1039_v4 = vadd.f32 %v3714_v48, %v3856_v61  ;;  %v2162_v10 = vmul.f32 -1.442695, %v1034_v22  ;;  %v1753_v40 = vpop.permute.xlu0 %1752 }
 0x165   :  { %v3750_v42 = vpop.eup %2527  ;;  %v1294_v43 = vadd.f32 1.0, %v2526_v14  ;;  %2553 = vpow2.f32 %v2160_v20  ;;  %v1044_v11 = vadd.f32 %v1043_v28, %v3857_v23  ;;  %v1962_v37 = vsel %vm1884_vm1, %v1859_v32, 0.0 }
 0x166   :  { %v1955_v47 = vadd.f32 %v1954_v36, %v1953_v3  ;;  %v2530_v52 = vpop.eup %2529  ;;  %v1861_v9 = vmul.f32 %v3726_v33, %v3690_v2  ;;  %v1964_v48 = vsel %vm1884_vm1, %v1860_v53, 0.0  ;;  %v1862_v17 = vmul.f32 %v2524_v31, %v3695_v50  ;;  %v1758_v14 = vpop.permute.xlu1 %1757 }
 0x167   :  { %v2532_v1 = vpop.eup %2531  ;;  %2555 = vrcp.f32 %v1294_v43  ;;  %v2163_v18 = vmul.f32 -1.442695, %v1039_v4  ;;  %v1049_v63 = vadd.f32 %v2328_v46, %v3858_v39  ;;  %v2164_v35 = vmul.f32 -1.442695, %v1044_v11 }
 0x168   :  { %v1957_v8 = vadd.f32 %v1956_v29, %v1955_v47  ;;  %v2534_v59 = vpop.eup %2533  ;;  %v1296_v5 = vadd.f32 1.0, %v2532_v1  ;;  %2557 = vpow2.f32 %v2161_v13  ;;  %v1966_v2 = vsel %vm1884_vm1, %v1861_v9, 0.0  ;;  %v1763_v15 = vpop.permute.xlu0 %1762 }
 0x169   :  { %v2536_v60 = vpop.eup %2535  ;;  %2559 = vpow2.f32 %v2162_v10  ;;  %v1863_v33 = vmul.f32 %v3739_v57, %v3707_v38  ;;  %v1968_v50 = vsel %vm1884_vm1, %v1862_v17, 0.0  ;;  %v1864_v31 = vmul.f32 %v2530_v52, %v3716_v25 }
 0x16a   :  { %v1959_v16 = vadd.f32 %v1958_v49, %v1957_v8  ;;  %v2538_v34 = vpop.eup %2537  ;;  %2561 = vrcp.f32 %v1296_v5  ;;  %v2165_v36 = vmul.f32 -1.442695, %v1049_v63  ;;  %v1865_v38 = vmul.f32 %v3750_v42, %v3728_v30  ;;  %v1768_v43 = vpop.permute.xlu1 %1767 }
 0x16b   :  { %v2540_v26 = vpop.eup %2539  ;;  %v1297_v54 = vadd.f32 1.0, %v2538_v34  ;;  %2563 = vpow2.f32 %v2163_v18  ;;  %v1970_v55 = vsel %vm1884_vm1, %v1863_v33, 0.0  ;;  %v1972_v57 = vsel %vm1884_vm1, %v1864_v31, 0.0 }
 0x16c   :  { %v1961_v0 = vadd.f32 %v1960_v41, %v1959_v16  ;;  %v2542_v51 = vpop.eup %2541  ;;  %v1298_v45 = vadd.f32 1.0, %v2540_v26  ;;  %2565 = vpow2.f32 %v2164_v35  ;;  %v1866_v25 = vmul.f32 %v2536_v60, %v3737_v27  ;;  %v1773_v32 = vpop.permute.xlu0 %1772 }
 0x16d   :  { %v2544_v44 = vpop.eup %2543  ;;  %2567 = vrcp.f32 %v1297_v54  ;;  %v1299_v7 = vadd.f32 1.0, %v2542_v51  ;;  %v1974_v8 = vsel %vm1884_vm1, %v1865_v38, 0.0  ;;  %v1867_v1 = vmul.f32 %v2534_v59, %v3748_v58 }
 0x16e   :  { %v1963_v6 = vadd.f32 %v1962_v37, %v1961_v0  ;;  %v2546_v46 = vpop.eup %2545  ;;  %2569 = vrcp.f32 %v1298_v45  ;;  %v1976_v30 = vsel %vm1884_vm1, %v1866_v25, 0.0  ;;  %v1869_v10 = vmul.f32 %v2544_v44, %v3763_v56  ;;  %v1778_v11 = vpop.permute.xlu1 %1777 }
 0x16f   :  { %v2548_v21 = vpop.eup %2547  ;;  %2571 = vpow2.f32 %v2165_v36  ;;  %v1868_v42 = vmul.f32 %v2546_v46, %v3753_v62  ;;  %v1978_v16 = vsel %vm1884_vm1, %v1867_v1, 0.0 }
 0x170   :  { %v1965_v12 = vadd.f32 %v1964_v48, %v1963_v6  ;;  %v2550_v19 = vpop.eup %2549  ;;  %v1300_v24 = vadd.f32 1.0, %v2548_v21  ;;  %2573 = vrcp.f32 %v1299_v7  ;;  %v1783_v37 = vpop.permute.xlu0 %1782  ;;  %v1982_v48 = vsel %vm1884_vm1, %v1869_v10, 0.0 }
 0x171   :  { %v2552_v20 = vpop.eup %2551  ;;  %v1980_v58 = vsel %vm1884_vm1, %v1868_v42, 0.0  ;;  %v1871_v17 = vmul.f32 %v2550_v19, %v1758_v14 }
 0x172   :  { %v1967_v3 = vadd.f32 %v1966_v2, %v1965_v12  ;;  %v2554_v22 = vpop.eup %2553  ;;  %v1301_v27 = vadd.f32 1.0, %v2552_v20  ;;  %2575 = vrcp.f32 %v1300_v24  ;;  %v1788_v51 = vpop.permute.xlu1 %1787 }
 0x173   :  { %v1302_v53 = vadd.f32 1.0, %v2554_v22  ;;  %v1986_v54 = vsel %vm1884_vm1, %v1871_v17, 0.0 }
 0x174   :  { %v1969_v29 = vadd.f32 %v1968_v50, %v1967_v3  ;;  %v2556_v28 = vpop.eup %2555  ;;  %2577 = vrcp.f32 %v1301_v27  ;;  %v1793_v50 = vpop.permute.xlu0 %1792 }
 0x175   :  { %v2558_v41 = vpop.eup %2557  ;;  %v1870_v59 = vmul.f32 %v2556_v28, %v1753_v40  ;;  %2579 = vrcp.f32 %v1302_v53 }
 0x176   :  { %v1971_v47 = vadd.f32 %v1970_v55, %v1969_v29  ;;  %v2560_v13 = vpop.eup %2559  ;;  %v1303_v23 = vadd.f32 1.0, %v2558_v41  ;;  %v1798_v19 = vpop.permute.xlu1 %1797 }
 0x177   :  { %v2562_v4 = vpop.eup %2561  ;;  %v1304_v5 = vadd.f32 1.0, %v2560_v13  ;;  %v1984_v18 = vsel %vm1884_vm1, %v1870_v59, 0.0 }
 0x178   :  { %v1973_v52 = vadd.f32 %v1972_v57, %v1971_v47  ;;  %v2564_v60 = vpop.eup %2563  ;;  %v1872_v56 = vmul.f32 %v2562_v4, %v1763_v15  ;;  %2581 = vrcp.f32 %v1303_v23  ;;  %v1803_v25 = vpop.permute.xlu0 %1802 }
 0x179   :  { %v2566_v0 = vpop.eup %2565  ;;  %v1305_v6 = vadd.f32 1.0, %v2564_v60  ;;  %2583 = vrcp.f32 %v1304_v5 }
 0x17a   :  { %v1975_v49 = vadd.f32 %v1974_v8, %v1973_v52  ;;  %v2568_v9 = vpop.eup %2567  ;;  %v1306_v39 = vadd.f32 1.0, %v2566_v0  ;;  %v1988_v44 = vsel %vm1884_vm1, %v1872_v56, 0.0  ;;  %v1808_v8 = vpop.permute.xlu1 %1807 }
 0x17b   :  { %v2570_v26 = vpop.eup %2569  ;;  %v1873_v12 = vmul.f32 %v2568_v9, %v1768_v43  ;;  %2585 = vrcp.f32 %v1305_v6 }
 0x17c   :  { %v1977_v61 = vadd.f32 %v1976_v30, %v1975_v49  ;;  %v2572_v63 = vpop.eup %2571  ;;  %v1874_v2 = vmul.f32 %v2570_v26, %v1773_v32  ;;  %2587 = vrcp.f32 %v1306_v39  ;;  %v1813_v32 = vpop.permute.xlu0 %1812 }
 0x17d   :  { %v2574_v31 = vpop.eup %2573  ;;  %v1307_v45 = vadd.f32 1.0, %v2572_v63  ;;  %v1990_v46 = vsel %vm1884_vm1, %v1873_v12, 0.0 }
 0x17e   :  { %v1979_v62 = vadd.f32 %v1978_v16, %v1977_v61  ;;  %v1875_v36 = vmul.f32 %v2574_v31, %v1778_v11  ;;  %v1992_v21 = vsel %vm1884_vm1, %v1874_v2, 0.0  ;;  %v1818_v59 = vpop.permute.xlu1 %1817 }
 0x17f   :  { %v2576_v3 = vpop.eup %2575  ;;  %2589 = vrcp.f32 %v1307_v45 }
 0x180   :  { %v1981_v34 = vadd.f32 %v1980_v58, %v1979_v62  ;;  %v1876_v29 = vmul.f32 %v2576_v3, %v1783_v37  ;;  %v1994_v7 = vsel %vm1884_vm1, %v1875_v36, 0.0 }
 0x181   :  { %v2578_v55 = vpop.eup %2577 }
 0x182   :  { %v1983_v40 = vadd.f32 %v1982_v48, %v1981_v34  ;;  %v2580_v38 = vpop.eup %2579  ;;  %v1877_v47 = vmul.f32 %v2578_v55, %v1788_v51  ;;  %v1996_v20 = vsel %vm1884_vm1, %v1876_v29, 0.0 }
 0x183   :  { %v1878_v24 = vmul.f32 %v2580_v38, %v1793_v50 }
 0x184   :  { %v1985_v35 = vadd.f32 %v1984_v18, %v1983_v40  ;;  %v1998_v1 = vsel %vm1884_vm1, %v1877_v47, 0.0  ;;  %v2019_v40 = vstv %s3813_s4 }
 0x185   :  { %v2582_v52 = vpop.eup %2581  ;;  %v2000_v42 = vsel %vm1884_vm1, %v1878_v24, 0.0 }
 0x186   :  { %v1987_v33 = vadd.f32 %v1986_v54, %v1985_v35  ;;  %v2584_v43 = vpop.eup %2583  ;;  %v1879_v30 = vmul.f32 %v2582_v52, %v1798_v19 }
 0x187   :  { %v1880_v27 = vmul.f32 %v2584_v43, %v1803_v25 }
 0x188   :  { %v1989_v14 = vadd.f32 %v1988_v44, %v1987_v33  ;;  %v2586_v41 = vpop.eup %2585  ;;  %v2002_v61 = vsel %vm1884_vm1, %v1879_v30, 0.0 }
 0x189   :  { %v2588_v53 = vpop.eup %2587  ;;  %v1881_v4 = vmul.f32 %v2586_v41, %v1808_v8  ;;  %v2004_v16 = vsel %vm1884_vm1, %v1880_v27, 0.0 }
 0x18a   :  { %v1991_v15 = vadd.f32 %v1990_v46, %v1989_v14  ;;  %v1882_v10 = vmul.f32 %v2588_v53, %v1813_v32 }
 0x18b   :  { %v2006_v11 = vsel %vm1884_vm1, %v1881_v4, 0.0 }
 0x18c   :  { %v1993_v57 = vadd.f32 %v1992_v21, %v1991_v15  ;;  %v2590_v23 = vpop.eup %2589  ;;  %v2008_v5 = vsel %vm1884_vm1, %v1882_v10, 0.0 }
 0x18d   :  { %v1883_v60 = vmul.f32 %v2590_v23, %v1818_v59 }
 0x18e   :  { %v1995_v22 = vadd.f32 %v1994_v7, %v1993_v57 }
 0x18f   :  { %v2010_v37 = vsel %vm1884_vm1, %v1883_v60, 0.0 }
 0x190   :  { %v1997_v28 = vadd.f32 %v1996_v20, %v1995_v22 }
 0x192   :  { %v1999_v49 = vadd.f32 %v1998_v1, %v1997_v28 }
 0x194   :  { %v2001_v13 = vadd.f32 %v2000_v42, %v1999_v49 }
 0x196   :  { %v2003_v58 = vadd.f32 %v2002_v61, %v2001_v13 }
 0x198   :  { %v2005_v62 = vadd.f32 %v2004_v16, %v2003_v58 }
 0x19a   :  { %v2007_v0 = vadd.f32 %v2006_v11, %v2005_v62 }
 0x19c   :  { %v2009_v34 = vadd.f32 %v2008_v5, %v2007_v0 }
 0x19e   :  { %v2011_v9 = vadd.f32 %v2010_v37, %v2009_v34 }
 0x1a0   :  { %v2012_v48 = vrot.slane %v2011_v9, 4 }
 0x1a2   :  { %v2013_v17 = vadd.f32 %v2012_v48, %v2011_v9 }
 0x1a4   :  { %v2014_v18 = vrot.slane %v2013_v17, 2 }
 0x1a6   :  { %v2015_v56 = vadd.f32 %v2014_v18, %v2013_v17 }
 0x1a8   :  { %v2016_v6 = vrot.slane %v2015_v56, 1 }
 0x1aa   :  { %v2017_v26 = vadd.f32 %v2016_v6, %v2015_v56 }
 0x1ac   :  { %v2020_v39 = vadd.f32 %v2019_v40, %v2017_v26 }
 0x1ae   :  { %2022 = vst.msk [vmem:[#allocation3] sm:$0x1] %vm2021_vm2, %v2020_v39 }
 0x1af   :  { %2602 = shalt.err (!%p2599_p4)
}
 0x1b0   :  { %2032 = dma.vmem_to_hbm [thread:$0]  %s2030_s29, 16, %s3814_s5, [#allocation4]  }
 0x1b1   :  { %2611 = dma.done.wait [#allocation4], 16  }
 0x1b2   :  { %2612 = vsyncadd [#allocation4], 4294967280 }
 0x1b3   :  { %2036 = vsyncpa [#allocation4], 1 }

</bundles_post_ra>
